<compile_context>
chip_gen: v7x
topology: tpu7x:2x2x1
jax: 0.10.0
libtpu: 0.0.40
codegen_flags: <defaults>
</compile_context>

<pallas_src>
import math

import jax
import jax.numpy as jnp
from jax.experimental import pallas as pl
from jax.experimental.pallas import tpu as pltpu

# ---- "args" configuration (mirrors IC3Net.__init__) ----
N_AGENTS = 8          # args.n_agents
HID = 128             # args.hid_size
COMM_PASSES = 2       # args.comm_passes
N_ACTIONS = 6         # action_space[0].n  -> naction_heads = [N_ACTIONS, 2]
OBS_C, OBS_H, OBS_W = 4, 8, 8
OBS_DIM = OBS_C * OBS_H * OBS_W          # 256
COMM_MODE_AVG = True  # args.comm_mode == 'avg'
HARD_ATTN = True      # args.hard_attn
COMM_MASK_ZERO = False

BT = 16                       # timesteps per grid block
M_ROWS = BT * N_AGENTS        # 128 rows per block (MXU-native)

HEAD_SLAB = 128               # [1 value | N_ACTIONS | 2 | zero pad]
V_OFF, H1_OFF, H2_OFF = 0, 1, 1 + N_ACTIONS
OUT_W = HID + HEAD_SLAB       # fused output slab width: [hidden | heads]


def _mxu(a, w_bf16):
    """bf16 x bf16 MXU matmul with f32 accumulation (activations stay f32 outside dots)."""
    return jnp.dot(a.astype(jnp.bfloat16), w_bf16, preferred_element_type=jnp.float32)


def ic3net_kernel(obs_ref, mask_ref, w_enc_ref, b_enc_ref,
                  wf_ref, wc_ref, bfc_ref, w_heads_ref, b_heads_ref,
                  out_ref):
    # --- state encoder: flatten + Linear + leaky_relu (nonlin=F.leaky_relu) ---
    z = _mxu(obs_ref[...], w_enc_ref[...]) + b_enc_ref[...]        # (M, HID) f32
    x = jnp.where(z > 0, z, 0.01 * z)                              # leaky_relu
    hidden = x

    mask = mask_ref[...]       # (M, M) bf16 block-diagonal effective comm mask^T

    # --- communication passes (static unroll; comm_passes is small) ---
    for p in range(COMM_PASSES):
        h_bf = hidden.astype(jnp.bfloat16)
        # comm_sum for all BT timesteps at once: one bf16 MXU matmul against the
        # block-diagonal mask (no cross-timestep leakage by construction).
        comm_sum = jnp.dot(mask, h_bf, preferred_element_type=jnp.float32)
        # hidden = tanh(x + f_modules[p](hidden) + C_modules[p](comm_sum))
        fc = (jnp.dot(h_bf, wf_ref[p], preferred_element_type=jnp.float32)
              + _mxu(comm_sum, wc_ref[p])
              + bfc_ref[p])
        hidden = jnp.tanh(x + fc)

    # --- fused lane-dense output slab: [hidden | value | head0 | head1 | zeros] ---
    out_ref[:, :HID] = hidden
    out_ref[:, HID:OUT_W] = _mxu(hidden, w_heads_ref[...]) + b_heads_ref[...]


def _build_effective_comm_mask_T(alive_mask, comm_action):
    """Folds comm_mask (ones - eye), agent_mask, agent_mask_transpose, hard-attn mask
    and the 'avg' scaling into one (n, n) matrix; kernel then does M^T @ hidden."""
    n = N_AGENTS
    if COMM_MASK_ZERO:
        base = jnp.zeros((n, n), jnp.float32)
    else:
        base = jnp.ones((n, n), jnp.float32) - jnp.eye(n, dtype=jnp.float32)
    m = alive_mask
    if HARD_ATTN:
        m = m * comm_action
    M = base * m[:, None] * m[None, :]
    num_alive = jnp.sum(alive_mask)
    if COMM_MODE_AVG:
        scale = jnp.where(num_alive > 1, 1.0 / (num_alive - 1.0), 1.0)
        M = M * scale
    return M.T.astype(jnp.float32)


def _block_diag(masks):
    """(bt, n, n) per-timestep masks -> (bt*n, bt*n) block-diagonal matrix."""
    bt, n, _ = masks.shape
    eye = jnp.eye(bt, dtype=masks.dtype)
    bd = masks[:, :, None, :] * eye[:, None, :, None]     # (bt, n, bt, n)
    return bd.reshape(bt * n, bt * n)


def _pack_params(params):
    """Pre-sum bf+bc, pack the three heads into one lane-dense slab; weights -> bf16."""
    bfc = params['bf'] + params['bc']                                   # (P, 1, H)

    w_heads = jnp.zeros((HID, HEAD_SLAB), jnp.float32)
    w_heads = w_heads.at[:, V_OFF:V_OFF + 1].set(params['wv'])
    w_heads = w_heads.at[:, H1_OFF:H1_OFF + N_ACTIONS].set(params['wh1'])
    w_heads = w_heads.at[:, H2_OFF:H2_OFF + 2].set(params['wh2'])
    b_heads = jnp.zeros((1, HEAD_SLAB), jnp.float32)
    b_heads = b_heads.at[:, V_OFF:V_OFF + 1].set(params['bv'])
    b_heads = b_heads.at[:, H1_OFF:H1_OFF + N_ACTIONS].set(params['bh1'])
    b_heads = b_heads.at[:, H2_OFF:H2_OFF + 2].set(params['bh2'])

    return {
        'w_enc': params['w_enc'].astype(jnp.bfloat16),
        'b_enc': params['b_enc'].astype(jnp.float32),
        'wf': params['wf'].astype(jnp.bfloat16),
        'wc': params['wc'].astype(jnp.bfloat16),
        'bfc': bfc.astype(jnp.float32),
        'w_heads': w_heads.astype(jnp.bfloat16),
        'b_heads': b_heads.astype(jnp.float32),
    }


@jax.jit
def ic3net_forward(obs, alive_mask, comm_action, packed):
    """obs: (B, n_agents, C, H, W); alive_mask/comm_action: (B, n_agents).
    B is a batch of independent timesteps (the PyTorch forward does one at a time with
    batch_size=1); semantics per timestep are identical. B is padded up to a multiple
    of BT; padded timesteps are discarded before returning."""
    B = obs.shape[0]
    G = -(-B // BT)             # grid length (number of BT-timestep blocks)
    B_pad = G * BT
    pad = B_pad - B

    obs_flat = obs.reshape(B, N_AGENTS, OBS_DIM).astype(jnp.float32)
    alive = alive_mask.astype(jnp.float32)
    comm = comm_action.astype(jnp.float32)
    if pad:
        obs_flat = jnp.concatenate(
            [obs_flat, jnp.zeros((pad, N_AGENTS, OBS_DIM), jnp.float32)], axis=0)
        alive = jnp.concatenate([alive, jnp.zeros((pad, N_AGENTS), jnp.float32)], axis=0)
        comm = jnp.concatenate([comm, jnp.zeros((pad, N_AGENTS), jnp.float32)], axis=0)

    # Per-timestep effective mask, embedded block-diagonally per grid block (bf16).
    m_t = jax.vmap(_build_effective_comm_mask_T)(alive, comm)          # (B_pad, n, n)
    m_blk = m_t.reshape(G, BT, N_AGENTS, N_AGENTS)
    mask_bd = jax.vmap(_block_diag)(m_blk)                             # (G, M, M)
    mask_2d = mask_bd.reshape(G * M_ROWS, M_ROWS).astype(jnp.bfloat16)

    obs_2d = obs_flat.reshape(B_pad * N_AGENTS, OBS_DIM)

    # Weights use a constant index_map so their blocks stay resident in VMEM across the grid.
    pinned = lambda shape: pl.BlockSpec(shape, lambda g: (0,) * len(shape))

    grid_spec = pltpu.PrefetchScalarGridSpec(
        num_scalar_prefetch=0,
        grid=(G,),
        in_specs=[
            pl.BlockSpec((M_ROWS, OBS_DIM), lambda g: (g, 0)),     # obs rows
            pl.BlockSpec((M_ROWS, M_ROWS), lambda g: (g, 0)),      # block-diag comm mask
            pinned((OBS_DIM, HID)),                                # w_enc
            pinned((1, HID)),                                      # b_enc
            pinned((COMM_PASSES, HID, HID)),                       # wf
            pinned((COMM_PASSES, HID, HID)),                       # wc
            pinned((COMM_PASSES, 1, HID)),                         # bfc
            pinned((HID, HEAD_SLAB)),                              # w_heads
            pinned((1, HEAD_SLAB)),                                # b_heads
        ],
        out_specs=pl.BlockSpec((M_ROWS, OUT_W), lambda g: (g, 0)),  # fused [hidden|heads] slab
    )

    slab = pl.pallas_call(
        ic3net_kernel,
        out_shape=jax.ShapeDtypeStruct((B_pad * N_AGENTS, OUT_W), jnp.float32),
        grid_spec=grid_spec,
        compiler_params=pltpu.CompilerParams(dimension_semantics=("parallel",)),
    )(obs_2d, mask_2d,
      packed['w_enc'], packed['b_enc'],
      packed['wf'], packed['wc'], packed['bfc'],
      packed['w_heads'], packed['b_heads'])

    # Drop padding; slice the true head widths BEFORE softmax/argmax.
    slab = slab[:B * N_AGENTS].reshape(B, N_AGENTS, OUT_W)
    h = slab[:, :, :HID]
    value = slab[:, :, HID + V_OFF:HID + V_OFF + 1]
    logp1 = jax.nn.log_softmax(slab[:, :, HID + H1_OFF:HID + H1_OFF + N_ACTIONS], axis=-1)
    logp2 = jax.nn.log_softmax(slab[:, :, HID + H2_OFF:HID + H2_OFF + 2], axis=-1)

    # select_action(greedy=True): argmax per head (glue, not hot path)
    act0 = jnp.argmax(logp1, axis=-1)
    act1 = jnp.argmax(logp2, axis=-1)
    return h, value, logp1, logp2, (act0, act1)


# --------------------------- pure-JAX reference (sanity check) ---------------------------

def _ref_single(obs_flat, alive, comm_act, pk):
    mt = _build_effective_comm_mask_T(alive, comm_act).astype(jnp.bfloat16)
    z = _mxu(obs_flat, pk['w_enc']) + pk['b_enc']
    x = jnp.where(z > 0, z, 0.01 * z)
    hidden = x
    for p in range(COMM_PASSES):
        h_bf = hidden.astype(jnp.bfloat16)
        comm_sum = jnp.dot(mt, h_bf, preferred_element_type=jnp.float32)
        fc = (jnp.dot(h_bf, pk['wf'][p], preferred_element_type=jnp.float32)
              + _mxu(comm_sum, pk['wc'][p]) + pk['bfc'][p])
        hidden = jnp.tanh(x + fc)
    heads = _mxu(hidden, pk['w_heads']) + pk['b_heads']
    return hidden, heads


def _ref_forward(obs, alive_mask, comm_action, packed):
    B = obs.shape[0]
    obs_flat = obs.reshape(B, N_AGENTS, OBS_DIM).astype(jnp.float32)
    h, heads = jax.vmap(_ref_single, in_axes=(0, 0, 0, None))(
        obs_flat, alive_mask.astype(jnp.float32), comm_action.astype(jnp.float32), packed)
    value = heads[:, :, V_OFF:V_OFF + 1]
    logp1 = jax.nn.log_softmax(heads[:, :, H1_OFF:H1_OFF + N_ACTIONS], axis=-1)
    logp2 = jax.nn.log_softmax(heads[:, :, H2_OFF:H2_OFF + 2], axis=-1)
    return h, value, logp1, logp2


def _init_params(key):
    """Deterministic PyTorch-Linear-style init (uniform +-1/sqrt(fan_in))."""
    def uinit(k, shape, fan_in):
        b = 1.0 / math.sqrt(fan_in)
        return jax.random.uniform(k, shape, jnp.float32, -b, b)

    ks = jax.random.split(key, 12)
    return {
        'w_enc': uinit(ks[0], (OBS_DIM, HID), OBS_DIM),
        'b_enc': uinit(ks[1], (1, HID), OBS_DIM),
        'wf':    uinit(ks[2], (COMM_PASSES, HID, HID), HID),   # f_modules
        'bf':    uinit(ks[3], (COMM_PASSES, 1, HID), HID),
        'wc':    uinit(ks[4], (COMM_PASSES, HID, HID), HID),   # C_modules
        'bc':    uinit(ks[5], (COMM_PASSES, 1, HID), HID),
        'wv':    uinit(ks[6], (HID, 1), HID),                  # value_head
        'bv':    uinit(ks[7], (1, 1), HID),
        'wh1':   uinit(ks[8], (HID, N_ACTIONS), HID),          # heads[0]
        'bh1':   uinit(ks[9], (1, N_ACTIONS), HID),
        'wh2':   uinit(ks[10], (HID, 2), HID),                 # heads[1]
        'bh2':   uinit(ks[11], (1, 2), HID),
    }


if __name__ == "__main__":
    key = jax.random.PRNGKey(0)
    k_param, k_obs, k_alive, k_comm = jax.random.split(key, 4)
    params = _init_params(k_param)
    packed = _pack_params(params)

    # Batch of B=20 independent timesteps (padded to 32 -> grid of 2 blocks of 128 rows):
    # obs (B, n_agents, C, H, W), per-step info['alive_mask'] and info['comm_action'].
    B = 20
    obs = jax.random.normal(k_obs, (B, N_AGENTS, OBS_C, OBS_H, OBS_W), jnp.float32)
    alive_mask = (jax.random.uniform(k_alive, (B, N_AGENTS)) > 0.2).astype(jnp.float32)
    comm_action = (jax.random.uniform(k_comm, (B, N_AGENTS)) > 0.5).astype(jnp.float32)

    h, value, logp1, logp2, (act0, act1) = ic3net_forward(obs, alive_mask, comm_action, packed)
    jax.block_until_ready((h, value, logp1, logp2, act0, act1))

    # Sanity check against a pure-JAX reference doing the same math (bf16 weights, f32 acc).
    h_r, v_r, lp1_r, lp2_r = _ref_forward(obs, alive_mask, comm_action, packed)
    assert jnp.allclose(h, h_r, atol=2e-2, rtol=2e-2)
    assert jnp.allclose(value, v_r, atol=2e-2, rtol=2e-2)
    assert jnp.allclose(logp1, lp1_r, atol=2e-2, rtol=2e-2)
    assert jnp.allclose(logp2, lp2_r, atol=2e-2, rtol=2e-2)

    print("KERNEL_OK")
</pallas_src>

<mosaic_0001>
module attributes {stable_mosaic.version = 11 : i64} {
  func.func @ic3net_kernel(%arg0: i32, %arg1: memref<128x256xf32, #tpu.memory_space<vmem>>, %arg2: memref<128x128xbf16, #tpu.memory_space<vmem>>, %arg3: memref<256x128xbf16, #tpu.memory_space<vmem>>, %arg4: memref<1x128xf32, #tpu.memory_space<vmem>>, %arg5: memref<2x128x128xbf16, #tpu.memory_space<vmem>>, %arg6: memref<2x128x128xbf16, #tpu.memory_space<vmem>>, %arg7: memref<2x1x128xf32, #tpu.memory_space<vmem>>, %arg8: memref<128x128xbf16, #tpu.memory_space<vmem>>, %arg9: memref<1x128xf32, #tpu.memory_space<vmem>>, %arg10: memref<128x256xf32, #tpu.memory_space<vmem>>) attributes {dimension_semantics = [#tpu.dimension_semantics<parallel>], iteration_bounds = array<i64: 2>, scalar_prefetch = 0 : i64, scratch_operands = 0 : i64, tpu.core_type = #tpu.core_type<tc>, window_params = [{transform_indices = @transform_0, window_bounds = array<i64: 128, 256>}, {transform_indices = @transform_1, window_bounds = array<i64: 128, 128>}, {pipeline_mode = #tpu.pipeline_mode<synchronous>, transform_indices = @transform_2, window_bounds = array<i64: 256, 128>}, {pipeline_mode = #tpu.pipeline_mode<synchronous>, transform_indices = @transform_3, window_bounds = array<i64: 1, 128>}, {pipeline_mode = #tpu.pipeline_mode<synchronous>, transform_indices = @transform_4, window_bounds = array<i64: 2, 128, 128>}, {pipeline_mode = #tpu.pipeline_mode<synchronous>, transform_indices = @transform_5, window_bounds = array<i64: 2, 128, 128>}, {pipeline_mode = #tpu.pipeline_mode<synchronous>, transform_indices = @transform_6, window_bounds = array<i64: 2, 1, 128>}, {pipeline_mode = #tpu.pipeline_mode<synchronous>, transform_indices = @transform_7, window_bounds = array<i64: 128, 128>}, {pipeline_mode = #tpu.pipeline_mode<synchronous>, transform_indices = @transform_8, window_bounds = array<i64: 1, 128>}, {transform_indices = @transform_9, window_bounds = array<i64: 128, 256>}]} {
    %c0 = arith.constant 0 : index
    %c0_0 = arith.constant 0 : index
    %0 = vector.load %arg1[%c0, %c0_0] : memref<128x256xf32, #tpu.memory_space<vmem>>, vector<128x256xf32>
    %c0_1 = arith.constant 0 : index
    %c0_2 = arith.constant 0 : index
    %1 = vector.load %arg3[%c0_1, %c0_2] : memref<256x128xbf16, #tpu.memory_space<vmem>>, vector<256x128xbf16>
    %2 = arith.truncf %0 : vector<128x256xf32> to vector<128x256xbf16>
    %cst = arith.constant dense<0.000000e+00> : vector<128x128xf32>
    %3 = tpu.matmul %2, %1, %cst {dimension_numbers = #tpu.dot_dimension_numbers<[1], [0], [0], [1], [0, 0, 1, 1], [], []>} : vector<128x256xbf16>, vector<256x128xbf16>, vector<128x128xf32> -> vector<128x128xf32>
    %c0_3 = arith.constant 0 : index
    %c0_4 = arith.constant 0 : index
    %4 = vector.load %arg4[%c0_3, %c0_4] : memref<1x128xf32, #tpu.memory_space<vmem>>, vector<1x128xf32>
    %5 = vector.broadcast %4 : vector<1x128xf32> to vector<128x128xf32>
    %6 = arith.addf %3, %5 : vector<128x128xf32>
    %cst_5 = arith.constant 0.000000e+00 : f32
    %7 = vector.broadcast %cst_5 : f32 to vector<128x128xf32>
    %8 = arith.cmpf ogt, %6, %7 : vector<128x128xf32>
    %cst_6 = arith.constant 0.00999999977 : f32
    %9 = vector.broadcast %cst_6 : f32 to vector<128x128xf32>
    %10 = arith.mulf %9, %6 : vector<128x128xf32>
    %11 = arith.select %8, %6, %10 : vector<128x128xi1>, vector<128x128xf32>
    %c0_7 = arith.constant 0 : index
    %c0_8 = arith.constant 0 : index
    %12 = vector.load %arg2[%c0_7, %c0_8] : memref<128x128xbf16, #tpu.memory_space<vmem>>, vector<128x128xbf16>
    %13 = arith.truncf %11 : vector<128x128xf32> to vector<128x128xbf16>
    %cst_9 = arith.constant dense<0.000000e+00> : vector<128x128xf32>
    %14 = tpu.matmul %12, %13, %cst_9 {dimension_numbers = #tpu.dot_dimension_numbers<[1], [0], [0], [1], [0, 0, 1, 1], [], []>} : vector<128x128xbf16>, vector<128x128xbf16>, vector<128x128xf32> -> vector<128x128xf32>
    %c0_10 = arith.constant 0 : index
    %c0_11 = arith.constant 0 : index
    %c0_12 = arith.constant 0 : index
    %15 = vector.load %arg5[%c0_10, %c0_11, %c0_12] : memref<2x128x128xbf16, #tpu.memory_space<vmem>>, vector<1x128x128xbf16>
    %16 = vector.shape_cast %15 : vector<1x128x128xbf16> to vector<128x128xbf16>
    %cst_13 = arith.constant dense<0.000000e+00> : vector<128x128xf32>
    %17 = tpu.matmul %13, %16, %cst_13 {dimension_numbers = #tpu.dot_dimension_numbers<[1], [0], [0], [1], [0, 0, 1, 1], [], []>} : vector<128x128xbf16>, vector<128x128xbf16>, vector<128x128xf32> -> vector<128x128xf32>
    %c0_14 = arith.constant 0 : index
    %c0_15 = arith.constant 0 : index
    %c0_16 = arith.constant 0 : index
    %18 = vector.load %arg6[%c0_14, %c0_15, %c0_16] : memref<2x128x128xbf16, #tpu.memory_space<vmem>>, vector<1x128x128xbf16>
    %19 = vector.shape_cast %18 : vector<1x128x128xbf16> to vector<128x128xbf16>
    %20 = arith.truncf %14 : vector<128x128xf32> to vector<128x128xbf16>
    %cst_17 = arith.constant dense<0.000000e+00> : vector<128x128xf32>
    %21 = tpu.matmul %20, %19, %cst_17 {dimension_numbers = #tpu.dot_dimension_numbers<[1], [0], [0], [1], [0, 0, 1, 1], [], []>} : vector<128x128xbf16>, vector<128x128xbf16>, vector<128x128xf32> -> vector<128x128xf32>
    %22 = arith.addf %17, %21 : vector<128x128xf32>
    %c0_18 = arith.constant 0 : index
    %c0_19 = arith.constant 0 : index
    %c0_20 = arith.constant 0 : index
    %23 = vector.load %arg7[%c0_18, %c0_19, %c0_20] : memref<2x1x128xf32, #tpu.memory_space<vmem>>, vector<1x1x128xf32>
    %24 = vector.shape_cast %23 : vector<1x1x128xf32> to vector<1x128xf32>
    %25 = vector.broadcast %24 : vector<1x128xf32> to vector<128x128xf32>
    %26 = arith.addf %22, %25 : vector<128x128xf32>
    %27 = arith.addf %11, %26 : vector<128x128xf32>
    %28 = math.tanh %27 : vector<128x128xf32>
    %29 = arith.truncf %28 : vector<128x128xf32> to vector<128x128xbf16>
    %cst_21 = arith.constant dense<0.000000e+00> : vector<128x128xf32>
    %30 = tpu.matmul %12, %29, %cst_21 {dimension_numbers = #tpu.dot_dimension_numbers<[1], [0], [0], [1], [0, 0, 1, 1], [], []>} : vector<128x128xbf16>, vector<128x128xbf16>, vector<128x128xf32> -> vector<128x128xf32>
    %c1 = arith.constant 1 : index
    %c0_22 = arith.constant 0 : index
    %c0_23 = arith.constant 0 : index
    %31 = vector.load %arg5[%c1, %c0_22, %c0_23] : memref<2x128x128xbf16, #tpu.memory_space<vmem>>, vector<1x128x128xbf16>
    %32 = vector.shape_cast %31 : vector<1x128x128xbf16> to vector<128x128xbf16>
    %cst_24 = arith.constant dense<0.000000e+00> : vector<128x128xf32>
    %33 = tpu.matmul %29, %32, %cst_24 {dimension_numbers = #tpu.dot_dimension_numbers<[1], [0], [0], [1], [0, 0, 1, 1], [], []>} : vector<128x128xbf16>, vector<128x128xbf16>, vector<128x128xf32> -> vector<128x128xf32>
    %c1_25 = arith.constant 1 : index
    %c0_26 = arith.constant 0 : index
    %c0_27 = arith.constant 0 : index
    %34 = vector.load %arg6[%c1_25, %c0_26, %c0_27] : memref<2x128x128xbf16, #tpu.memory_space<vmem>>, vector<1x128x128xbf16>
    %35 = vector.shape_cast %34 : vector<1x128x128xbf16> to vector<128x128xbf16>
    %36 = arith.truncf %30 : vector<128x128xf32> to vector<128x128xbf16>
    %cst_28 = arith.constant dense<0.000000e+00> : vector<128x128xf32>
    %37 = tpu.matmul %36, %35, %cst_28 {dimension_numbers = #tpu.dot_dimension_numbers<[1], [0], [0], [1], [0, 0, 1, 1], [], []>} : vector<128x128xbf16>, vector<128x128xbf16>, vector<128x128xf32> -> vector<128x128xf32>
    %38 = arith.addf %33, %37 : vector<128x128xf32>
    %c1_29 = arith.constant 1 : index
    %c0_30 = arith.constant 0 : index
    %c0_31 = arith.constant 0 : index
    %39 = vector.load %arg7[%c1_29, %c0_30, %c0_31] : memref<2x1x128xf32, #tpu.memory_space<vmem>>, vector<1x1x128xf32>
    %40 = vector.shape_cast %39 : vector<1x1x128xf32> to vector<1x128xf32>
    %41 = vector.broadcast %40 : vector<1x128xf32> to vector<128x128xf32>
    %42 = arith.addf %38, %41 : vector<128x128xf32>
    %43 = arith.addf %11, %42 : vector<128x128xf32>
    %44 = math.tanh %43 : vector<128x128xf32>
    %c0_32 = arith.constant 0 : index
    %c0_33 = arith.constant 0 : index
    %45 = vector.load %arg10[%c0_32, %c0_33] : memref<128x256xf32, #tpu.memory_space<vmem>>, vector<128x128xf32>
    tpu.vector_store %arg10[%c0_32, %c0_33], %44 {strides = array<i32>} : memref<128x256xf32, #tpu.memory_space<vmem>>, vector<128x128xf32>,
    %c0_34 = arith.constant 0 : index
    %c0_35 = arith.constant 0 : index
    %46 = vector.load %arg8[%c0_34, %c0_35] : memref<128x128xbf16, #tpu.memory_space<vmem>>, vector<128x128xbf16>
    %47 = arith.truncf %44 : vector<128x128xf32> to vector<128x128xbf16>
    %cst_36 = arith.constant dense<0.000000e+00> : vector<128x128xf32>
    %48 = tpu.matmul %47, %46, %cst_36 {dimension_numbers = #tpu.dot_dimension_numbers<[1], [0], [0], [1], [0, 0, 1, 1], [], []>} : vector<128x128xbf16>, vector<128x128xbf16>, vector<128x128xf32> -> vector<128x128xf32>
    %c0_37 = arith.constant 0 : index
    %c0_38 = arith.constant 0 : index
    %49 = vector.load %arg9[%c0_37, %c0_38] : memref<1x128xf32, #tpu.memory_space<vmem>>, vector<1x128xf32>
    %50 = vector.broadcast %49 : vector<1x128xf32> to vector<128x128xf32>
    %51 = arith.addf %48, %50 : vector<128x128xf32>
    %c0_39 = arith.constant 0 : index
    %c128 = arith.constant 128 : index
    %52 = vector.load %arg10[%c0_39, %c128] : memref<128x256xf32, #tpu.memory_space<vmem>>, vector<128x128xf32>
    tpu.vector_store %arg10[%c0_39, %c128], %51 {strides = array<i32>} : memref<128x256xf32, #tpu.memory_space<vmem>>, vector<128x128xf32>,
    return
  }
  func.func @transform_0(%arg0: i32) -> (i32, i32) {
    %c0_i32 = arith.constant 0 : i32
    %c0_i32_0 = arith.constant 0 : i32
    return %arg0, %c0_i32 : i32, i32
  }
  func.func @transform_1(%arg0: i32) -> (i32, i32) {
    %c0_i32 = arith.constant 0 : i32
    %c0_i32_0 = arith.constant 0 : i32
    return %arg0, %c0_i32 : i32, i32
  }
  func.func @transform_2(%arg0: i32) -> (i32, i32) {
    %c0_i32 = arith.constant 0 : i32
    %c0_i32_0 = arith.constant 0 : i32
    %c0_i32_1 = arith.constant 0 : i32
    return %c0_i32, %c0_i32_0 : i32, i32
  }
  func.func @transform_3(%arg0: i32) -> (i32, i32) {
    %c0_i32 = arith.constant 0 : i32
    %c0_i32_0 = arith.constant 0 : i32
    %c0_i32_1 = arith.constant 0 : i32
    return %c0_i32, %c0_i32_0 : i32, i32
  }
  func.func @transform_4(%arg0: i32) -> (i32, i32, i32) {
    %c0_i32 = arith.constant 0 : i32
    %c0_i32_0 = arith.constant 0 : i32
    %c0_i32_1 = arith.constant 0 : i32
    %c0_i32_2 = arith.constant 0 : i32
    return %c0_i32, %c0_i32_0, %c0_i32_1 : i32, i32, i32
  }
  func.func @transform_5(%arg0: i32) -> (i32, i32, i32) {
    %c0_i32 = arith.constant 0 : i32
    %c0_i32_0 = arith.constant 0 : i32
    %c0_i32_1 = arith.constant 0 : i32
    %c0_i32_2 = arith.constant 0 : i32
    return %c0_i32, %c0_i32_0, %c0_i32_1 : i32, i32, i32
  }
  func.func @transform_6(%arg0: i32) -> (i32, i32, i32) {
    %c0_i32 = arith.constant 0 : i32
    %c0_i32_0 = arith.constant 0 : i32
    %c0_i32_1 = arith.constant 0 : i32
    %c0_i32_2 = arith.constant 0 : i32
    return %c0_i32, %c0_i32_0, %c0_i32_1 : i32, i32, i32
  }
  func.func @transform_7(%arg0: i32) -> (i32, i32) {
    %c0_i32 = arith.constant 0 : i32
    %c0_i32_0 = arith.constant 0 : i32
    %c0_i32_1 = arith.constant 0 : i32
    return %c0_i32, %c0_i32_0 : i32, i32
  }
  func.func @transform_8(%arg0: i32) -> (i32, i32) {
    %c0_i32 = arith.constant 0 : i32
    %c0_i32_0 = arith.constant 0 : i32
    %c0_i32_1 = arith.constant 0 : i32
    return %c0_i32, %c0_i32_0 : i32, i32
  }
  func.func @transform_9(%arg0: i32) -> (i32, i32) {
    %c0_i32 = arith.constant 0 : i32
    %c0_i32_0 = arith.constant 0 : i32
    return %arg0, %c0_i32 : i32, i32
  }
}

</mosaic_0001>

<bundles_post_ra>
// kernel: ic3net_forward.1
= control target key start
LH: loop header
LB: loop body
LE: loop exit
PB: predicated region body
PF: predicated region fallthrough
CT: control target
= control target key end

     0   :  { %s2761_s30 = smov 0   ;;  %s3289_s0 = inlined_call_operand.vmem [shape: f32[256,256], index: 0, kind: input, shape index: {}]   ;;  %s3290_s1 = inlined_call_operand.vmem [shape: bf16[256,128], index: 1, kind: input, shape index: {}]   ;;  %s3291_s2 = inlined_call_operand.vmem [shape: bf16[256,128], index: 2, kind: input, shape index: {}]   ;;  %s3292_s3 = inlined_call_operand.vmem [shape: f32[1,128], index: 3, kind: input, shape index: {}]   ;;  %s3293_s4 = inlined_call_operand.vmem [shape: bf16[2,128,128], index: 4, kind: input, shape index: {}]   ;;  %s3294_s5 = inlined_call_operand.vmem [shape: bf16[2,128,128], index: 5, kind: input, shape index: {}]   ;;  %s3295_s6 = inlined_call_operand.vmem [shape: f32[2,1,128], index: 6, kind: input, shape index: {}]   ;;  %s3296_s7 = inlined_call_operand.vmem [shape: bf16[128,128], index: 7, kind: input, shape index: {}]   ;;  %s3297_s8 = inlined_call_operand.vmem [shape: f32[1,128], index: 8, kind: input, shape index: {}]   ;;  %s3298_s9 = inlined_call_operand.vmem [shape: f32[256,256], index: 9, kind: output, shape index: {}]  }
   0x1 LB: > { %s2017_s10 = sadd.s32 4294967295, %s2709_s30   ;;  %p2021_p0 = scmp.ge.s32.totalorder %s2709_s30, 1  ;;  %s2709_s30 = sphi %s2761_s30, %s19_s30  }
   0x2   : > { %p300_p1 = scmp.lt.s32.totalorder %s2709_s30, 3 }
   0x4   : > { %p301_p2 = pnand %p2021_p0, %p300_p1 }
   0x5   : > { %v2575_v0 = vld [vmem:[%s3291_s2 + $0x40] sm:$0xff] (!%p301_p2)   ;;  %s2022_s13 = sshll.u32 (!%p301_p2), %s2017_s10, 4  ;;  %v2577_v2 = vld [vmem:[%s3291_s2 + $0x48] sm:$0xff] (!%p301_p2)   ;;  %v2579_v4 = vld [vmem:[%s3291_s2 + $0x50] sm:$0xff] (!%p301_p2)  }
   0x6   : > { %304 = sbr.rel (%p301_p2) target bundleno = 1561 (0x619), region = 56  ;;  %v2576_v1 = vld [vmem:[%s3291_s2] sm:$0xff] (!%p301_p2)   ;;  %2135 = vmatprep.subr.bf16.mxu0 (!%p301_p2), %v2575_v0  ;;  %p344_p3 = scmp.lt.s32.totalorder (!%p301_p2), %s2022_s13, 31  ;;  %v2578_v3 = vld [vmem:[%s3291_s2 + $0x8] sm:$0xff] (!%p301_p2)   ;;  %v2580_v5 = vld [vmem:[%s3291_s2 + $0x10] sm:$0xff] (!%p301_p2)  }
   0x7   : > { %2136 = vmatpush3.bf16.msra.mxu0 (!%p301_p2), %v2576_v1  ;;  %v2581_v6 = vld [vmem:[%s3291_s2 + $0x58] sm:$0xff] (!%p301_p2)   ;;  %v2583_v8 = vld [vmem:[%s3291_s2 + $0x60] sm:$0xff] (!%p301_p2)   ;;  %v2585_v10 = vld [vmem:[%s3291_s2 + $0x68] sm:$0xff] (!%p301_p2)  }
   0x8   : > { %2137 = vmatprep.subr.bf16.mxu0 (!%p301_p2), %v2577_v2  ;;  %v2582_v7 = vld [vmem:[%s3291_s2 + $0x18] sm:$0xff] (!%p301_p2)   ;;  %v2584_v9 = vld [vmem:[%s3291_s2 + $0x20] sm:$0xff] (!%p301_p2)   ;;  %v2586_v14 = vld [vmem:[%s3291_s2 + $0x28] sm:$0xff] (!%p301_p2)  }
   0x9   : > { %v2587_v15 = vld [vmem:[%s3291_s2 + $0x70] sm:$0xff] (!%p301_p2)   ;;  %v2589_v17 = vld [vmem:[%s3291_s2 + $0x78] sm:$0xff] (!%p301_p2)   ;;  %v2869_v2 = vld [vmem:[%s3292_s3] ss:$0 sm:$0xff] (!%p301_p2) }
   0xa   : > { %v2588_v16 = vld [vmem:[%s3291_s2 + $0x30] sm:$0xff] (!%p301_p2)   ;;  %v2590_v18 = vld [vmem:[%s3291_s2 + $0x38] sm:$0xff] (!%p301_p2)  }
   0xb   : > { %2138 = vmatpush3.bf16.msra.mxu0 (!%p301_p2), %v2578_v3 }
   0xc   : > { %2139 = vmatprep.subr.bf16.mxu0 (!%p301_p2), %v2579_v4 }
   0xd   : > { %s3300_s13 = smov (!%p344_p3, %s2022_s13), 31 }
   0xe   : > { %s2133_s26 = sshll.u32 %s3300_s13, 4  ;;  %s2026_s10 = sshll.u32 %s3300_s13, 2 }
   0xf   : > { %2140 = vmatpush3.bf16.msra.mxu0 %v2580_v5  ;;  %s2804_s14 = scalar_lea.vmem %s3289_s0, %s2133_s26  ;;  %s2863_s15 = scalar_lea.vmem %s3290_s1, %s2026_s10 }
  0x10   : > { %2141 = vmatprep.subr.bf16.mxu0 %v2581_v6  ;;  %v365_v11 = vld [vmem:[%s2804_s14 + $0x8] sm:$0xff]  ;;  %v367_v12 = vld [vmem:[%s2804_s14 + $0x18] sm:$0xff]  ;;  %v364_v19 = vld [vmem:[%s2804_s14] sm:$0xff]  ;;  %s3231_s12 = scalar_lea.vmem %s3298_s9, %s2133_s26 }
  0x11   : > { %v429_v13 = vpack.c.bf16 %v367_v12, %v365_v11  ;;  %v366_v20 = vld [vmem:[%s2804_s14 + $0x10] sm:$0xff]  ;;  %v369_v21 = vld [vmem:[%s2804_s14 + $0x28] sm:$0xff]  ;;  %v371_v22 = vld [vmem:[%s2804_s14 + $0x38] sm:$0xff] }
  0x12   : > { %v428_v23 = vpack.c.bf16 %v366_v20, %v364_v19  ;;  %v431_v24 = vpack.c.bf16 %v371_v22, %v369_v21  ;;  %v368_v25 = vld [vmem:[%s2804_s14 + $0x20] sm:$0xff]  ;;  %v370_v26 = vld [vmem:[%s2804_s14 + $0x30] sm:$0xff]  ;;  %v373_v27 = vld [vmem:[%s2804_s14 + $0x48] sm:$0xff] }
  0x13   : > { %2142 = vmatpush3.bf16.msra.mxu0 %v2582_v7  ;;  %579 = vmatprep.mubr.bf16.mxu0 %v429_v13  ;;  %v375_v28 = vld [vmem:[%s2804_s14 + $0x58] sm:$0xff]  ;;  %v430_v29 = vpack.c.bf16 %v370_v26, %v368_v25  ;;  %v372_v31 = vld [vmem:[%s2804_s14 + $0x40] sm:$0xff]  ;;  %v374_v32 = vld [vmem:[%s2804_s14 + $0x50] sm:$0xff] }
  0x14   : > { %2143 = vmatprep.subr.bf16.mxu0 %v2583_v8  ;;  %v433_v30 = vpack.c.bf16 %v375_v28, %v373_v27  ;;  %v377_v33 = vld [vmem:[%s2804_s14 + $0x68] sm:$0xff]  ;;  %v379_v34 = vld [vmem:[%s2804_s14 + $0x78] sm:$0xff]  ;;  %v432_v35 = vpack.c.bf16 %v374_v32, %v372_v31  ;;  %v376_v37 = vld [vmem:[%s2804_s14 + $0x60] sm:$0xff] }
  0x15   : > { %v435_v36 = vpack.c.bf16 %v379_v34, %v377_v33  ;;  %v378_v38 = vld [vmem:[%s2804_s14 + $0x70] sm:$0xff]  ;;  %v381_v39 = vld [vmem:[%s2804_s14 + $0x88] sm:$0xff]  ;;  %v383_v40 = vld [vmem:[%s2804_s14 + $0x98] sm:$0xff] }
  0x16   : > { %v434_v41 = vpack.c.bf16 %v378_v38, %v376_v37  ;;  %v437_v42 = vpack.c.bf16 %v383_v40, %v381_v39  ;;  %v380_v43 = vld [vmem:[%s2804_s14 + $0x80] sm:$0xff]  ;;  %v382_v44 = vld [vmem:[%s2804_s14 + $0x90] sm:$0xff]  ;;  %v385_v45 = vld [vmem:[%s2804_s14 + $0xa8] sm:$0xff] }
  0x17   : > { %2144 = vmatpush3.bf16.msra.mxu0 %v2584_v9  ;;  %v387_v46 = vld [vmem:[%s2804_s14 + $0xb8] sm:$0xff]  ;;  %v436_v47 = vpack.c.bf16 %v382_v44, %v380_v43  ;;  %v384_v49 = vld [vmem:[%s2804_s14 + $0xa0] sm:$0xff]  ;;  %v386_v50 = vld [vmem:[%s2804_s14 + $0xb0] sm:$0xff] }
  0x18   : > { %2145 = vmatprep.subr.bf16.mxu0 %v2585_v10  ;;  %v439_v48 = vpack.c.bf16 %v387_v46, %v385_v45  ;;  %v389_v51 = vld [vmem:[%s2804_s14 + $0xc8] sm:$0xff]  ;;  %v391_v52 = vld [vmem:[%s2804_s14 + $0xd8] sm:$0xff]  ;;  %v438_v53 = vpack.c.bf16 %v386_v50, %v384_v49  ;;  %v388_v55 = vld [vmem:[%s2804_s14 + $0xc0] sm:$0xff] }
  0x19   : > { %v441_v54 = vpack.c.bf16 %v391_v52, %v389_v51  ;;  %v390_v56 = vld [vmem:[%s2804_s14 + $0xd0] sm:$0xff]  ;;  %v393_v57 = vld [vmem:[%s2804_s14 + $0xe8] sm:$0xff]  ;;  %v395_v58 = vld [vmem:[%s2804_s14 + $0xf8] sm:$0xff] }
  0x1a   : > { %v440_v59 = vpack.c.bf16 %v390_v56, %v388_v55  ;;  %v443_v60 = vpack.c.bf16 %v395_v58, %v393_v57  ;;  %v392_v61 = vld [vmem:[%s2804_s14 + $0xe0] sm:$0xff]  ;;  %v394_v62 = vld [vmem:[%s2804_s14 + $0xf0] sm:$0xff] }
  0x1b   : > { %2146 = vmatpush3.bf16.msra.mxu0 %v2586_v14  ;;  %v442_v63 = vpack.c.bf16 %v394_v62, %v392_v61  ;;  %v2591_v0 = vld [vmem:[%s2863_s15] sm:$0xff]  }
  0x1c   : > { %2147 = vmatprep.subr.bf16.mxu0 %v2587_v15  ;;  %2327 = vmatprep.mubr.bf16.mxu1 %v2591_v0 }
  0x1f   : > { %2148 = vmatpush3.bf16.msra.mxu0 %v2588_v16 }
  0x20   : > { %2149 = vmatprep.subr.bf16.mxu0 %v2589_v17 }
  0x23   : > { %2150 = vmatpush3.bf16.msra.mxu0 %v2590_v18 }
  0x26   : > { %580 = vmatmul.mubr.bf16.vlgmr.msra.gmra.mrb[0].mxu0 %v428_v23 }
  0x27   : > { %587 = vmatprep.mubr.bf16.mxu0 %v431_v24 }
  0x2e   : > { %588 = vmatmul.mubr.bf16.gmra.mrb[4].mxu0 %v430_v29 }
  0x2f   : > { %595 = vmatprep.mubr.bf16.mxu0 %v433_v30 }
  0x36   : > { %596 = vmatmul.mubr.bf16.gmra.mrb[8].mxu0 %v432_v35 }
  0x37   : > { %603 = vmatprep.mubr.bf16.mxu0 %v435_v36 }
  0x3e   : > { %604 = vmatmul.mubr.bf16.gmra.mrb[12].mxu0 %v434_v41 }
  0x3f   : > { %611 = vmatprep.mubr.bf16.mxu0 %v437_v42 }
  0x46   : > { %612 = vmatmul.mubr.bf16.gmra.mrb[16].mxu0 %v436_v47 }
  0x47   : > { %619 = vmatprep.mubr.bf16.mxu0 %v439_v48 }
  0x4e   : > { %620 = vmatmul.mubr.bf16.gmra.mrb[20].mxu0 %v438_v53 }
  0x4f   : > { %627 = vmatprep.mubr.bf16.mxu0 %v441_v54 }
  0x56   : > { %628 = vmatmul.mubr.bf16.gmra.mrb[24].mxu0 %v440_v59 }
  0x57   : > { %635 = vmatprep.mubr.bf16.mxu0 %v443_v60 }
  0x5e   : > { %636 = vmatmul.mubr.bf16.gmra.mrb[28].mxu0 %v442_v63 }
  0x5f   : > { %2423 = vmatprep.mubr.bf16.mxu0 %v2591_v0 }
  0xf9   : > { %v2151_v1 = vpop.f32.mrb[0].mxu0 }
  0xfa   : > { %v2152_v3 = vpop.f32.mrb[1].mxu0 }
  0xfb   : > { %v2153_v4 = vadd.f32 %v2152_v3, %v2151_v1  ;;  %v2154_v5 = vpop.f32.mrb[2].mxu0 }
  0xfc   : > { %v2155_v6 = vpop.f32.mrb[3].mxu0 }
  0xfd   : > { %v582_v7 = vadd.f32 %v2153_v4, %v2869_v2  ;;  %v2156_v8 = vadd.f32 %v2155_v6, %v2154_v5 }
  0xff   : > { %v660_v9 = vmul.f32 0.01, %v582_v7  ;;  %v585_v10 = vadd.f32 %v2156_v8, %v2869_v2  ;;  %vm644_vm0 = vcmp.gt.f32.partialorder %v582_v7, 0.0 }
 0x101   : > { %vm645_vm1 = vcmp.gt.f32.partialorder %v585_v10, 0.0  ;;  %v661_v11 = vmul.f32 0.01, %v585_v10  ;;  %v2157_v12 = vpop.f32.mrb[4].mxu0  ;;  %v2873_v16 = vsel %vm644_vm0, %v582_v7, %v660_v9 }
 0x102   : > { %v2158_v13 = vpop.f32.mrb[5].mxu0 }
 0x103   : > { %v2159_v14 = vadd.f32 %v2158_v13, %v2157_v12  ;;  %v2160_v15 = vpop.f32.mrb[6].mxu0  ;;  %v2875_v17 = vsel %vm645_vm1, %v585_v10, %v661_v11 }
 0x104   : > { %v2161_v18 = vpop.f32.mrb[7].mxu0  ;;  %v2879_v19 = vpack.c.bf16 %v2875_v17, %v2873_v16 }
 0x105   : > { %v590_v20 = vadd.f32 %v2159_v14, %v2869_v2  ;;  %v2162_v21 = vadd.f32 %v2161_v18, %v2160_v15 }
 0x106   : > { %2311 = vmatprep.subr.bf16.mxu1 %v2879_v19 }
 0x107   : > { %v662_v22 = vmul.f32 0.01, %v590_v20  ;;  %v593_v23 = vadd.f32 %v2162_v21, %v2869_v2  ;;  %2312 = vmatpush3.bf16.msra.mxu1 %v2879_v19  ;;  %vm646_vm2 = vcmp.gt.f32.partialorder %v590_v20, 0.0 }
 0x109   : > { %vm647_vm3 = vcmp.gt.f32.partialorder %v593_v23, 0.0  ;;  %v663_v24 = vmul.f32 0.01, %v593_v23  ;;  %v2163_v25 = vpop.f32.mrb[8].mxu0  ;;  %v2885_v29 = vsel %vm646_vm2, %v590_v20, %v662_v22 }
 0x10a   : > { %v2164_v26 = vpop.f32.mrb[9].mxu0 }
 0x10b   : > { %v2165_v27 = vadd.f32 %v2164_v26, %v2163_v25  ;;  %v2166_v28 = vpop.f32.mrb[10].mxu0  ;;  %v2887_v30 = vsel %vm647_vm3, %v593_v23, %v663_v24 }
 0x10c   : > { %v2167_v31 = vpop.f32.mrb[11].mxu0  ;;  %v2891_v32 = vpack.c.bf16 %v2887_v30, %v2885_v29 }
 0x10d   : > { %v598_v33 = vadd.f32 %v2165_v27, %v2869_v2  ;;  %v2168_v34 = vadd.f32 %v2167_v31, %v2166_v28 }
 0x10e   : > { %2313 = vmatprep.subr.bf16.mxu1 %v2891_v32 }
 0x10f   : > { %v664_v35 = vmul.f32 0.01, %v598_v33  ;;  %v601_v36 = vadd.f32 %v2168_v34, %v2869_v2  ;;  %2314 = vmatpush3.bf16.msra.mxu1 %v2891_v32  ;;  %vm648_vm4 = vcmp.gt.f32.partialorder %v598_v33, 0.0 }
 0x111   : > { %vm649_vm5 = vcmp.gt.f32.partialorder %v601_v36, 0.0  ;;  %v665_v37 = vmul.f32 0.01, %v601_v36  ;;  %v2169_v38 = vpop.f32.mrb[12].mxu0  ;;  %v2897_v42 = vsel %vm648_vm4, %v598_v33, %v664_v35 }
 0x112   : > { %v2170_v39 = vpop.f32.mrb[13].mxu0 }
 0x113   : > { %v2171_v40 = vadd.f32 %v2170_v39, %v2169_v38  ;;  %v2172_v41 = vpop.f32.mrb[14].mxu0  ;;  %v2899_v43 = vsel %vm649_vm5, %v601_v36, %v665_v37 }
 0x114   : > { %v2173_v44 = vpop.f32.mrb[15].mxu0  ;;  %v2903_v45 = vpack.c.bf16 %v2899_v43, %v2897_v42 }
 0x115   : > { %v606_v46 = vadd.f32 %v2171_v40, %v2869_v2  ;;  %v2174_v47 = vadd.f32 %v2173_v44, %v2172_v41 }
 0x116   : > { %2315 = vmatprep.subr.bf16.mxu1 %v2903_v45 }
 0x117   : > { %v666_v48 = vmul.f32 0.01, %v606_v46  ;;  %v609_v49 = vadd.f32 %v2174_v47, %v2869_v2  ;;  %2316 = vmatpush3.bf16.msra.mxu1 %v2903_v45  ;;  %vm650_vm6 = vcmp.gt.f32.partialorder %v606_v46, 0.0 }
 0x119   : > { %vm651_vm7 = vcmp.gt.f32.partialorder %v609_v49, 0.0  ;;  %v667_v50 = vmul.f32 0.01, %v609_v49  ;;  %v2175_v51 = vpop.f32.mrb[16].mxu0  ;;  %v2909_v55 = vsel %vm650_vm6, %v606_v46, %v666_v48 }
 0x11a   : > { %v2176_v52 = vpop.f32.mrb[17].mxu0 }
 0x11b   : > { %v2177_v53 = vadd.f32 %v2176_v52, %v2175_v51  ;;  %v2178_v54 = vpop.f32.mrb[18].mxu0  ;;  %v2911_v56 = vsel %vm651_vm7, %v609_v49, %v667_v50  ;;  %v2599_v52 = vld [vmem:[%s3294_s5] sm:$0xff]  }
 0x11c   : > { %v2179_v57 = vpop.f32.mrb[19].mxu0  ;;  %v2915_v58 = vpack.c.bf16 %v2911_v56, %v2909_v55 }
 0x11d   : > { %v614_v59 = vadd.f32 %v2177_v53, %v2869_v2  ;;  %v2180_v60 = vadd.f32 %v2179_v57, %v2178_v54  ;;  %v2974_v53 = vld [vmem:[%s2863_s15 + $0x10] sm:$0xff]   ;;  %v2600_v54 = vld [vmem:[%s3294_s5 + $0x8] sm:$0xff]  }
 0x11e   : > { %2317 = vmatprep.subr.bf16.mxu1 %v2915_v58  ;;  %v2601_v57 = vld [vmem:[%s3294_s5 + $0x10] sm:$0xff]  }
 0x11f   : > { %v668_v61 = vmul.f32 0.01, %v614_v59  ;;  %v617_v62 = vadd.f32 %v2180_v60, %v2869_v2  ;;  %2318 = vmatpush3.bf16.msra.mxu1 %v2915_v58  ;;  %vm652_vm8 = vcmp.gt.f32.partialorder %v614_v59, 0.0  ;;  %v2988_v60 = vld [vmem:[%s2863_s15 + $0x20] sm:$0xff]  }
 0x121   : > { %vm653_vm9 = vcmp.gt.f32.partialorder %v617_v62, 0.0  ;;  %v669_v63 = vmul.f32 0.01, %v617_v62  ;;  %v2181_v0 = vpop.f32.mrb[20].mxu0  ;;  %v2921_v5 = vsel %vm652_vm8, %v614_v59, %v668_v61  ;;  %v2985_v59 = vld [vmem:[%s2863_s15 + $0x18] sm:$0xff]  }
 0x122   : > { %v2182_v1 = vpop.f32.mrb[21].mxu0  ;;  %v2602_v61 = vld [vmem:[%s3294_s5 + $0x18] sm:$0xff]  }
 0x123   : > { %v2183_v3 = vadd.f32 %v2182_v1, %v2181_v0  ;;  %v2184_v4 = vpop.f32.mrb[22].mxu0  ;;  %v2923_v6 = vsel %vm653_vm9, %v617_v62, %v669_v63  ;;  %v2603_v62 = vld [vmem:[%s3294_s5 + $0x20] sm:$0xff]   ;;  %v2999_v63 = vld [vmem:[%s2863_s15 + $0x28] sm:$0xff]   ;;  %v3002_v0 = vld [vmem:[%s2863_s15 + $0x30] sm:$0xff]  }
 0x124   : > { %v2185_v7 = vpop.f32.mrb[23].mxu0  ;;  %v2927_v8 = vpack.c.bf16 %v2923_v6, %v2921_v5  ;;  %v2604_v1 = vld [vmem:[%s3294_s5 + $0x28] sm:$0xff]  }
 0x125   : > { %v622_v9 = vadd.f32 %v2183_v3, %v2869_v2  ;;  %v2186_v10 = vadd.f32 %v2185_v7, %v2184_v4  ;;  %v2605_v3 = vld [vmem:[%s3294_s5 + $0x30] sm:$0xff]   ;;  %v3013_v4 = vld [vmem:[%s2863_s15 + $0x38] sm:$0xff]  }
 0x126   : > { %2319 = vmatprep.subr.bf16.mxu1 %v2927_v8  ;;  %v2606_v7 = vld [vmem:[%s3294_s5 + $0x38] sm:$0xff]  }
 0x127   : > { %v670_v11 = vmul.f32 0.01, %v622_v9  ;;  %v625_v12 = vadd.f32 %v2186_v10, %v2869_v2  ;;  %2320 = vmatpush3.bf16.msra.mxu1 %v2927_v8  ;;  %vm654_vm10 = vcmp.gt.f32.partialorder %v622_v9, 0.0 }
 0x129   : > { %vm655_vm11 = vcmp.gt.f32.partialorder %v625_v12, 0.0  ;;  %v671_v13 = vmul.f32 0.01, %v625_v12  ;;  %v2187_v14 = vpop.f32.mrb[24].mxu0  ;;  %v2933_v21 = vsel %vm654_vm10, %v622_v9, %v670_v11  ;;  %v2607_v9 = vld [vmem:[%s3293_s4] sm:$0xff]  }
 0x12a   : > { %v2188_v15 = vpop.f32.mrb[25].mxu0 }
 0x12b   : > { %v2189_v18 = vadd.f32 %v2188_v15, %v2187_v14  ;;  %v2190_v20 = vpop.f32.mrb[26].mxu0  ;;  %v2935_v22 = vsel %vm655_vm11, %v625_v12, %v671_v13 }
 0x12c   : > { %v2191_v23 = vpop.f32.mrb[27].mxu0  ;;  %v2939_v24 = vpack.c.bf16 %v2935_v22, %v2933_v21 }
 0x12d   : > { %v630_v25 = vadd.f32 %v2189_v18, %v2869_v2  ;;  %v2192_v26 = vadd.f32 %v2191_v23, %v2190_v20  ;;  %v2608_v18 = vld [vmem:[%s3293_s4 + $0x8] sm:$0xff]  }
 0x12e   : > { %2321 = vmatprep.subr.bf16.mxu1 %v2939_v24 }
 0x12f   : > { %v672_v27 = vmul.f32 0.01, %v630_v25  ;;  %v633_v28 = vadd.f32 %v2192_v26, %v2869_v2  ;;  %2322 = vmatpush3.bf16.msra.mxu1 %v2939_v24  ;;  %vm656_vm12 = vcmp.gt.f32.partialorder %v630_v25, 0.0 }
 0x131   : > { %vm657_vm13 = vcmp.gt.f32.partialorder %v633_v28, 0.0  ;;  %v673_v31 = vmul.f32 0.01, %v633_v28  ;;  %v2193_v33 = vpop.f32.mrb[28].mxu0  ;;  %v2945_v37 = vsel %vm656_vm12, %v630_v25, %v672_v27  ;;  %v2609_v25 = vld [vmem:[%s3293_s4 + $0x10] sm:$0xff]  }
 0x132   : > { %v2194_v34 = vpop.f32.mrb[29].mxu0 }
 0x133   : > { %v2195_v35 = vadd.f32 %v2194_v34, %v2193_v33  ;;  %v2196_v36 = vpop.f32.mrb[30].mxu0  ;;  %v2947_v38 = vsel %vm657_vm13, %v633_v28, %v673_v31  ;;  %v2610_v33 = vld [vmem:[%s3293_s4 + $0x18] sm:$0xff]  }
 0x134   : > { %v2197_v39 = vpop.f32.mrb[31].mxu0  ;;  %v2951_v40 = vpack.c.bf16 %v2947_v38, %v2945_v37 }
 0x135   : > { %v638_v41 = vadd.f32 %v2195_v35, %v2869_v2  ;;  %v2198_v44 = vadd.f32 %v2197_v39, %v2196_v36  ;;  %v2611_v36 = vld [vmem:[%s3293_s4 + $0x20] sm:$0xff]  }
 0x136   : > { %2323 = vmatprep.subr.bf16.mxu1 %v2951_v40 }
 0x137   : > { %v674_v46 = vmul.f32 0.01, %v638_v41  ;;  %v641_v47 = vadd.f32 %v2198_v44, %v2869_v2  ;;  %2324 = vmatpush3.bf16.msra.mxu1 %v2951_v40  ;;  %vm658_vm14 = vcmp.gt.f32.partialorder %v638_v41, 0.0  ;;  %v2970_v2 = vld [vmem:[%s2863_s15 + $0x8] sm:$0xff]  }
 0x139   : > { %vm659_vm15 = vcmp.gt.f32.partialorder %v641_v47, 0.0  ;;  %v675_v48 = vmul.f32 0.01, %v641_v47  ;;  %v2957_v49 = vsel %vm658_vm14, %v638_v41, %v674_v46 }
 0x13b   : > { %v2959_v50 = vsel %vm659_vm15, %v641_v47, %v675_v48  ;;  %v2612_v47 = vld [vmem:[%s3293_s4 + $0x28] sm:$0xff]  }
 0x13c   : > { %v2963_v51 = vpack.c.bf16 %v2959_v50, %v2957_v49 }
 0x13e   : > { %2325 = vmatprep.subr.bf16.mxu1 %v2963_v51 }
 0x13f   : > { %2326 = vmatpush3.bf16.msra.mxu1 %v2963_v51 }
 0x140   : > { %2343 = vmatprep.subr.bf16.mxu1 %v2599_v52 }
 0x142   : > { %2328 = vmatmul.mubr.bf16.vlgmr.msra.gmra.mrb[0].mxu1 %v2970_v2 }
 0x143   : > { %2331 = vmatprep.mubr.bf16.mxu1 %v2974_v53  ;;  %2344 = vmatpush3.bf16.msra.mxu1 %v2599_v52 }
 0x144   : > { %2345 = vmatprep.subr.bf16.mxu1 %v2600_v54 }
 0x147   : > { %2346 = vmatpush3.bf16.msra.mxu1 %v2600_v54  ;;  %v2613_v54 = vld [vmem:[%s3293_s4 + $0x30] sm:$0xff]  }
 0x148   : > { %2347 = vmatprep.subr.bf16.mxu1 %v2601_v57 }
 0x14a   : > { %2332 = vmatmul.mubr.bf16.gmra.mrb[4].mxu1 %v2985_v59 }
 0x14b   : > { %2335 = vmatprep.mubr.bf16.mxu1 %v2988_v60  ;;  %2348 = vmatpush3.bf16.msra.mxu1 %v2601_v57 }
 0x14c   : > { %2349 = vmatprep.subr.bf16.mxu1 %v2602_v61 }
 0x14f   : > { %2350 = vmatpush3.bf16.msra.mxu1 %v2602_v61 }
 0x150   : > { %2351 = vmatprep.subr.bf16.mxu1 %v2603_v62 }
 0x152   : > { %2336 = vmatmul.mubr.bf16.gmra.mrb[8].mxu1 %v2999_v63 }
 0x153   : > { %2339 = vmatprep.mubr.bf16.mxu1 %v3002_v0  ;;  %2352 = vmatpush3.bf16.msra.mxu1 %v2603_v62 }
 0x154   : > { %2353 = vmatprep.subr.bf16.mxu1 %v2604_v1 }
 0x157   : > { %2354 = vmatpush3.bf16.msra.mxu1 %v2604_v1 }
 0x158   : > { %2355 = vmatprep.subr.bf16.mxu1 %v2605_v3 }
 0x15a   : > { %2340 = vmatmul.mubr.bf16.gmra.mrb[12].mxu1 %v3013_v4 }
 0x15b   : > { %2356 = vmatpush3.bf16.msra.mxu1 %v2605_v3  ;;  %v2614_v3 = vld [vmem:[%s3293_s4 + $0x38] sm:$0xff]  }
 0x15c   : > { %2357 = vmatprep.subr.bf16.mxu1 %v2606_v7 }
 0x15f   : > { %2358 = vmatpush3.bf16.msra.mxu1 %v2606_v7 }
 0x160   : > { %2375 = vmatprep.subr.bf16.mxu1 %v2607_v9 }
 0x215   : > { %v2329_v10 = vpop.f32.mrb[0].mxu1 }
 0x216   : > { %v798_v11 = vpop.f32.mrb[1].mxu1 }
 0x217   : > { %v2330_v12 = vpop.f32.mrb[2].mxu1 }
 0x218   : > { %v894_v13 = vpack.c.bf16 %v2330_v12, %v2329_v10  ;;  %v801_v14 = vpop.f32.mrb[3].mxu1 }
 0x219   : > { %v893_v15 = vpack.c.bf16 %v801_v14, %v798_v11 }
 0x21b   : > { %2359 = vmatprep.mubr.bf16.mxu1 %v893_v15 }
 0x21c   : > { %2360 = vmatmul.mubr.bf16.vlgmr.msra.gmra.mrb[16].mxu1 %v894_v13 }
 0x21d   : > { %v2333_v20 = vpop.f32.mrb[4].mxu1  ;;  %2376 = vmatpush3.bf16.msra.mxu1 %v2607_v9 }
 0x21e   : > { %v814_v23 = vpop.f32.mrb[5].mxu1  ;;  %2377 = vmatprep.subr.bf16.mxu1 %v2608_v18 }
 0x21f   : > { %v2334_v26 = vpop.f32.mrb[6].mxu1 }
 0x220   : > { %v896_v27 = vpack.c.bf16 %v2334_v26, %v2333_v20  ;;  %v817_v28 = vpop.f32.mrb[7].mxu1 }
 0x221   : > { %v895_v31 = vpack.c.bf16 %v817_v28, %v814_v23  ;;  %2378 = vmatpush3.bf16.msra.mxu1 %v2608_v18 }
 0x222   : > { %2379 = vmatprep.subr.bf16.mxu1 %v2609_v25 }
 0x223   : > { %2363 = vmatprep.mubr.bf16.mxu1 %v895_v31 }
 0x224   : > { %2364 = vmatmul.mubr.bf16.gmra.mrb[20].mxu1 %v896_v27 }
 0x225   : > { %v2337_v34 = vpop.f32.mrb[8].mxu1  ;;  %2380 = vmatpush3.bf16.msra.mxu1 %v2609_v25 }
 0x226   : > { %v830_v35 = vpop.f32.mrb[9].mxu1  ;;  %2381 = vmatprep.subr.bf16.mxu1 %v2610_v33 }
 0x227   : > { %v2338_v39 = vpop.f32.mrb[10].mxu1 }
 0x228   : > { %v898_v41 = vpack.c.bf16 %v2338_v39, %v2337_v34  ;;  %v833_v44 = vpop.f32.mrb[11].mxu1 }
 0x229   : > { %v897_v46 = vpack.c.bf16 %v833_v44, %v830_v35  ;;  %2382 = vmatpush3.bf16.msra.mxu1 %v2610_v33 }
 0x22a   : > { %2383 = vmatprep.subr.bf16.mxu1 %v2611_v36 }
 0x22b   : > { %2367 = vmatprep.mubr.bf16.mxu1 %v897_v46 }
 0x22c   : > { %2368 = vmatmul.mubr.bf16.gmra.mrb[24].mxu1 %v898_v41 }
 0x22d   : > { %v2341_v48 = vpop.f32.mrb[12].mxu1  ;;  %2384 = vmatpush3.bf16.msra.mxu1 %v2611_v36 }
 0x22e   : > { %v846_v52 = vpop.f32.mrb[13].mxu1  ;;  %2385 = vmatprep.subr.bf16.mxu1 %v2612_v47 }
 0x22f   : > { %v2342_v57 = vpop.f32.mrb[14].mxu1 }
 0x230   : > { %v900_v61 = vpack.c.bf16 %v2342_v57, %v2341_v48  ;;  %v849_v62 = vpop.f32.mrb[15].mxu1 }
 0x231   : > { %v899_v1 = vpack.c.bf16 %v849_v62, %v846_v52  ;;  %2386 = vmatpush3.bf16.msra.mxu1 %v2612_v47 }
 0x232   : > { %2387 = vmatprep.subr.bf16.mxu1 %v2613_v54 }
 0x233   : > { %2371 = vmatprep.mubr.bf16.mxu1 %v899_v1 }
 0x234   : > { %2372 = vmatmul.mubr.bf16.gmra.mrb[28].mxu1 %v900_v61 }
 0x235   : > { %2388 = vmatpush3.bf16.msra.mxu1 %v2613_v54  ;;  %2391 = vmatprep.mubr.bf16.mxu1 %v2879_v19  ;;  %v3054_v19 = vld [vmem:[%s3295_s6] ss:$0 sm:$0xff] }
 0x236   : > { %2389 = vmatprep.subr.bf16.mxu1 %v2614_v3 }
 0x239   : > { %2390 = vmatpush3.bf16.msra.mxu1 %v2614_v3 }
 0x23c   : > { %2392 = vmatmul.mubr.bf16.vlgmr.msra.gmra.mrb[16].mxu1 %v2891_v32 }
 0x23d   : > { %2395 = vmatprep.mubr.bf16.mxu1 %v2903_v45 }
 0x244   : > { %2396 = vmatmul.mubr.bf16.gmra.mrb[20].mxu1 %v2915_v58 }
 0x245   : > { %2399 = vmatprep.mubr.bf16.mxu1 %v2927_v8 }
 0x24c   : > { %2400 = vmatmul.mubr.bf16.gmra.mrb[24].mxu1 %v2939_v24 }
 0x24d   : > { %2403 = vmatprep.mubr.bf16.mxu1 %v2951_v40 }
 0x254   : > { %2404 = vmatmul.mubr.bf16.gmra.mrb[28].mxu1 %v2963_v51 }
 0x30f   : > { %v2393_v7 = vpop.f32.mrb[16].mxu1 }
 0x310   : > { %v1200_v32 = vadd.f32 %v2393_v7, %v3054_v19  ;;  %v1128_v9 = vpop.f32.mrb[17].mxu1 }
 0x311   : > { %v1198_v45 = vadd.f32 %v3054_v19, %v1128_v9  ;;  %v2394_v58 = vpop.f32.mrb[18].mxu1 }
 0x312   : > { %v1216_v8 = vadd.f32 %v1200_v32, %v2885_v29  ;;  %v1201_v24 = vadd.f32 %v2394_v58, %v3054_v19  ;;  %v1131_v10 = vpop.f32.mrb[19].mxu1 }
 0x313   : > { %v1214_v40 = vadd.f32 %v1198_v45, %v2873_v16  ;;  %v1199_v51 = vadd.f32 %v3054_v19, %v1131_v10 }
 0x314   : > { %2639 = vtanh.f32 %v1216_v8  ;;  %v1217_v11 = vadd.f32 %v1201_v24, %v2887_v30 }
 0x315   : > { %2641 = vtanh.f32 %v1214_v40  ;;  %v1215_v12 = vadd.f32 %v1199_v51, %v2875_v17 }
 0x316   : > { %2643 = vtanh.f32 %v1217_v11 }
 0x317   : > { %2645 = vtanh.f32 %v1215_v12  ;;  %v2397_v13 = vpop.f32.mrb[20].mxu1 }
 0x318   : > { %v1204_v14 = vadd.f32 %v2397_v13, %v3054_v19  ;;  %v1144_v15 = vpop.f32.mrb[21].mxu1 }
 0x319   : > { %v1202_v18 = vadd.f32 %v3054_v19, %v1144_v15  ;;  %v2398_v20 = vpop.f32.mrb[22].mxu1 }
 0x31a   : > { %v1220_v23 = vadd.f32 %v1204_v14, %v2909_v55  ;;  %v1205_v25 = vadd.f32 %v2398_v20, %v3054_v19  ;;  %v1147_v26 = vpop.f32.mrb[23].mxu1 }
 0x31b   : > { %v1218_v27 = vadd.f32 %v1202_v18, %v2897_v42  ;;  %v1203_v28 = vadd.f32 %v3054_v19, %v1147_v26 }
 0x31c   : > { %2647 = vtanh.f32 %v1220_v23  ;;  %v1221_v31 = vadd.f32 %v1205_v25, %v2911_v56 }
 0x31d   : > { %2649 = vtanh.f32 %v1218_v27  ;;  %v1219_v33 = vadd.f32 %v1203_v28, %v2899_v43 }
 0x31e   : > { %v2640_v34 = vpop.eup %2639  ;;  %2651 = vtanh.f32 %v1221_v31 }
 0x31f   : > { %v2642_v35 = vpop.eup %2641  ;;  %2653 = vtanh.f32 %v1219_v33  ;;  %v2401_v36 = vpop.f32.mrb[24].mxu1 }
 0x320   : > { %v2644_v39 = vpop.eup %2643  ;;  %v1208_v41 = vadd.f32 %v2401_v36, %v3054_v19  ;;  %v1160_v44 = vpop.f32.mrb[25].mxu1 }
 0x321   : > { %v2646_v46 = vpop.eup %2645  ;;  %v1206_v47 = vadd.f32 %v3054_v19, %v1160_v44  ;;  %v2402_v48 = vpop.f32.mrb[26].mxu1  ;;  %v3074_v52 = vpack.c.bf16 %v2644_v39, %v2640_v34 }
 0x322   : > { %v1224_v54 = vadd.f32 %v1208_v41, %v2933_v21  ;;  %v1209_v57 = vadd.f32 %v2402_v48, %v3054_v19  ;;  %v1163_v61 = vpop.f32.mrb[27].mxu1  ;;  %v3078_v62 = vpack.c.bf16 %v2646_v46, %v2642_v35  ;;  %v2616_v48 = vld [vmem:[%s3294_s5 + $0x48] sm:$0xff]  }
 0x323   : > { %v1222_v1 = vadd.f32 %v1206_v47, %v2921_v5  ;;  %v1207_v3 = vadd.f32 %v3054_v19, %v1163_v61  ;;  %v2615_v47 = vld [vmem:[%s3294_s5 + $0x40] sm:$0xff]   ;;  %v2633_v61 = vld [vmem:[%s3296_s7 + $0x10] sm:$0xff]  }
 0x324   : > { %2655 = vtanh.f32 %v1224_v54  ;;  %v1225_v7 = vadd.f32 %v1209_v57, %v2935_v22  ;;  %2407 = vmatprep.subr.bf16.mxu0 %v3078_v62  ;;  %v2617_v54 = vld [vmem:[%s3294_s5 + $0x50] sm:$0xff]   ;;  %v2618_v57 = vld [vmem:[%s3294_s5 + $0x58] sm:$0xff]  }
 0x325   : > { %2657 = vtanh.f32 %v1222_v1  ;;  %v1223_v32 = vadd.f32 %v1207_v3, %v2923_v6  ;;  %2408 = vmatpush3.bf16.msra.mxu0 %v3078_v62 }
 0x326   : > { %v2648_v9 = vpop.eup %2647  ;;  %2659 = vtanh.f32 %v1225_v7  ;;  %2409 = vmatprep.subr.bf16.mxu0 %v3074_v52 }
 0x327   : > { %v2650_v45 = vpop.eup %2649  ;;  %2661 = vtanh.f32 %v1223_v32  ;;  %v2405_v58 = vpop.f32.mrb[28].mxu1 }
 0x328   : > { %v2652_v8 = vpop.eup %2651  ;;  %v1212_v24 = vadd.f32 %v2405_v58, %v3054_v19  ;;  %v1176_v10 = vpop.f32.mrb[29].mxu1  ;;  %v2624_v58 = vld [vmem:[%s3293_s4 + $0x48] sm:$0xff]  }
 0x329   : > { %v2654_v40 = vpop.eup %2653  ;;  %v1210_v51 = vadd.f32 %v3054_v19, %v1176_v10  ;;  %v2406_v11 = vpop.f32.mrb[30].mxu1  ;;  %2410 = vmatpush3.bf16.msra.mxu0 %v3074_v52  ;;  %v3090_v12 = vpack.c.bf16 %v2652_v8, %v2648_v9  ;;  %v2625_v10 = vld [vmem:[%s3293_s4 + $0x50] sm:$0xff]  }
 0x32a   : > { %v1228_v13 = vadd.f32 %v1212_v24, %v2957_v49  ;;  %v1213_v14 = vadd.f32 %v2406_v11, %v3054_v19  ;;  %v1179_v15 = vpop.f32.mrb[31].mxu1  ;;  %v3094_v18 = vpack.c.bf16 %v2654_v40, %v2650_v45 }
 0x32b   : > { %v1226_v20 = vadd.f32 %v1210_v51, %v2945_v37  ;;  %v1211_v23 = vadd.f32 %v3054_v19, %v1179_v15 }
 0x32c   : > { %2663 = vtanh.f32 %v1228_v13  ;;  %v1229_v25 = vadd.f32 %v1213_v14, %v2959_v50  ;;  %2411 = vmatprep.subr.bf16.mxu0 %v3094_v18  ;;  %v2626_v14 = vld [vmem:[%s3293_s4 + $0x58] sm:$0xff]  }
 0x32d   : > { %2665 = vtanh.f32 %v1226_v20  ;;  %v1227_v26 = vadd.f32 %v1211_v23, %v2947_v38  ;;  %2412 = vmatpush3.bf16.msra.mxu0 %v3094_v18  ;;  %v2627_v23 = vld [vmem:[%s3293_s4 + $0x60] sm:$0xff]  }
 0x32e   : > { %v2656_v27 = vpop.eup %2655  ;;  %2667 = vtanh.f32 %v1229_v25  ;;  %2413 = vmatprep.subr.bf16.mxu0 %v3090_v12 }
 0x32f   : > { %v2658_v28 = vpop.eup %2657  ;;  %2669 = vtanh.f32 %v1227_v26 }
 0x330   : > { %v2660_v31 = vpop.eup %2659 }
 0x331   : > { %v2662_v33 = vpop.eup %2661  ;;  %2414 = vmatpush3.bf16.msra.mxu0 %v3090_v12  ;;  %v3104_v19 = vpack.c.bf16 %v2660_v31, %v2656_v27  ;;  %v2628_v31 = vld [vmem:[%s3293_s4 + $0x68] sm:$0xff]  }
 0x332   : > { %v3106_v34 = vpack.c.bf16 %v2662_v33, %v2658_v28 }
 0x334   : > { %2415 = vmatprep.subr.bf16.mxu0 %v3106_v34 }
 0x335   : > { %2416 = vmatpush3.bf16.msra.mxu0 %v3106_v34 }
 0x336   : > { %v2664_v35 = vpop.eup %2663  ;;  %2417 = vmatprep.subr.bf16.mxu0 %v3104_v19 }
 0x337   : > { %v2666_v36 = vpop.eup %2665 }
 0x338   : > { %v2668_v39 = vpop.eup %2667 }
 0x339   : > { %v2670_v41 = vpop.eup %2669  ;;  %2418 = vmatpush3.bf16.msra.mxu0 %v3104_v19  ;;  %v3112_v44 = vpack.c.bf16 %v2668_v39, %v2664_v35 }
 0x33a   : > { %v3114_v46 = vpack.c.bf16 %v2670_v41, %v2666_v36  ;;  %v2629_v36 = vld [vmem:[%s3293_s4 + $0x70] sm:$0xff]  }
 0x33c   : > { %2419 = vmatprep.subr.bf16.mxu0 %v3114_v46 }
 0x33d   : > { %2420 = vmatpush3.bf16.msra.mxu0 %v3114_v46 }
 0x33e   : > { %2421 = vmatprep.subr.bf16.mxu0 %v3112_v44 }
 0x341   : > { %2422 = vmatpush3.bf16.msra.mxu0 %v3112_v44 }
 0x342   : > { %2439 = vmatprep.subr.bf16.mxu0 %v2615_v47 }
 0x344   : > { %2424 = vmatmul.mubr.bf16.vlgmr.msra.gmra.mrb[32].mxu0 %v2970_v2  ;;  %v2619_v2 = vld [vmem:[%s3294_s5 + $0x60] sm:$0xff]  }
 0x345   : > { %2427 = vmatprep.mubr.bf16.mxu0 %v2974_v53  ;;  %2440 = vmatpush3.bf16.msra.mxu0 %v2615_v47  ;;  %v2620_v53 = vld [vmem:[%s3294_s5 + $0x68] sm:$0xff]  }
 0x346   : > { %2441 = vmatprep.subr.bf16.mxu0 %v2616_v48 }
 0x349   : > { %2442 = vmatpush3.bf16.msra.mxu0 %v2616_v48 }
 0x34a   : > { %2443 = vmatprep.subr.bf16.mxu0 %v2617_v54 }
 0x34c   : > { %2428 = vmatmul.mubr.bf16.gmra.mrb[36].mxu0 %v2985_v59  ;;  %v2621_v59 = vld [vmem:[%s3294_s5 + $0x70] sm:$0xff]  }
 0x34d   : > { %2431 = vmatprep.mubr.bf16.mxu0 %v2988_v60  ;;  %2444 = vmatpush3.bf16.msra.mxu0 %v2617_v54  ;;  %v2622_v60 = vld [vmem:[%s3294_s5 + $0x78] sm:$0xff]  }
 0x34e   : > { %2445 = vmatprep.subr.bf16.mxu0 %v2618_v57  ;;  %v2630_v54 = vld [vmem:[%s3293_s4 + $0x78] sm:$0xff]  }
 0x351   : > { %2446 = vmatpush3.bf16.msra.mxu0 %v2618_v57 }
 0x352   : > { %2447 = vmatprep.subr.bf16.mxu0 %v2619_v2 }
 0x354   : > { %2432 = vmatmul.mubr.bf16.gmra.mrb[40].mxu0 %v2999_v63  ;;  %v2623_v63 = vld [vmem:[%s3293_s4 + $0x40] sm:$0xff]  }
 0x355   : > { %2435 = vmatprep.mubr.bf16.mxu0 %v3002_v0  ;;  %2448 = vmatpush3.bf16.msra.mxu0 %v2619_v2  ;;  %v2631_v0 = vld [vmem:[%s3296_s7] sm:$0xff]  }
 0x356   : > { %2449 = vmatprep.subr.bf16.mxu0 %v2620_v53  ;;  %2503 = vmatprep.subr.bf16.mxu1 %v2631_v0 }
 0x357   : > { %2504 = vmatpush3.bf16.msra.mxu1 %v2631_v0 }
 0x359   : > { %2450 = vmatpush3.bf16.msra.mxu0 %v2620_v53 }
 0x35a   : > { %2451 = vmatprep.subr.bf16.mxu0 %v2621_v59 }
 0x35c   : > { %2436 = vmatmul.mubr.bf16.gmra.mrb[44].mxu0 %v3013_v4  ;;  %v2632_v4 = vld [vmem:[%s3296_s7 + $0x8] sm:$0xff]  }
 0x35d   : > { %2452 = vmatpush3.bf16.msra.mxu0 %v2621_v59  ;;  %2505 = vmatprep.subr.bf16.mxu1 %v2632_v4 }
 0x35e   : > { %2453 = vmatprep.subr.bf16.mxu0 %v2622_v60  ;;  %2506 = vmatpush3.bf16.msra.mxu1 %v2632_v4 }
 0x35f   : > { %2507 = vmatprep.subr.bf16.mxu1 %v2633_v61 }
 0x361   : > { %2454 = vmatpush3.bf16.msra.mxu0 %v2622_v60 }
 0x362   : > { %2471 = vmatprep.subr.bf16.mxu0 %v2623_v63  ;;  %2508 = vmatpush3.bf16.msra.mxu1 %v2633_v61 }
 0x417   : > { %v2425_v1 = vpop.f32.mrb[32].mxu0 }
 0x418   : > { %v1288_v3 = vpop.f32.mrb[33].mxu0 }
 0x419   : > { %v2426_v7 = vpop.f32.mrb[34].mxu0 }
 0x41a   : > { %v1386_v32 = vpack.c.bf16 %v2426_v7, %v2425_v1  ;;  %v1291_v9 = vpop.f32.mrb[35].mxu0 }
 0x41b   : > { %v1385_v45 = vpack.c.bf16 %v1291_v9, %v1288_v3 }
 0x41d   : > { %2455 = vmatprep.mubr.bf16.mxu0 %v1385_v45 }
 0x41e   : > { %2456 = vmatmul.mubr.bf16.vlgmr.msra.gmra.mrb[48].mxu0 %v1386_v32 }
 0x41f   : > { %v2429_v8 = vpop.f32.mrb[36].mxu0  ;;  %2472 = vmatpush3.bf16.msra.mxu0 %v2623_v63 }
 0x420   : > { %v1304_v24 = vpop.f32.mrb[37].mxu0  ;;  %2473 = vmatprep.subr.bf16.mxu0 %v2624_v58 }
 0x421   : > { %v2430_v40 = vpop.f32.mrb[38].mxu0 }
 0x422   : > { %v1388_v51 = vpack.c.bf16 %v2430_v40, %v2429_v8  ;;  %v1307_v11 = vpop.f32.mrb[39].mxu0 }
 0x423   : > { %v1387_v13 = vpack.c.bf16 %v1307_v11, %v1304_v24  ;;  %2474 = vmatpush3.bf16.msra.mxu0 %v2624_v58 }
 0x424   : > { %2475 = vmatprep.subr.bf16.mxu0 %v2625_v10 }
 0x425   : > { %2459 = vmatprep.mubr.bf16.mxu0 %v1387_v13 }
 0x426   : > { %2460 = vmatmul.mubr.bf16.gmra.mrb[52].mxu0 %v1388_v51 }
 0x427   : > { %v2433_v15 = vpop.f32.mrb[40].mxu0  ;;  %2476 = vmatpush3.bf16.msra.mxu0 %v2625_v10 }
 0x428   : > { %v1320_v20 = vpop.f32.mrb[41].mxu0  ;;  %2477 = vmatprep.subr.bf16.mxu0 %v2626_v14 }
 0x429   : > { %v2434_v25 = vpop.f32.mrb[42].mxu0 }
 0x42a   : > { %v1390_v26 = vpack.c.bf16 %v2434_v25, %v2433_v15  ;;  %v1323_v27 = vpop.f32.mrb[43].mxu0 }
 0x42b   : > { %v1389_v28 = vpack.c.bf16 %v1323_v27, %v1320_v20  ;;  %2478 = vmatpush3.bf16.msra.mxu0 %v2626_v14 }
 0x42c   : > { %2479 = vmatprep.subr.bf16.mxu0 %v2627_v23 }
 0x42d   : > { %2463 = vmatprep.mubr.bf16.mxu0 %v1389_v28 }
 0x42e   : > { %2464 = vmatmul.mubr.bf16.gmra.mrb[56].mxu0 %v1390_v26 }
 0x42f   : > { %v2437_v33 = vpop.f32.mrb[44].mxu0  ;;  %2480 = vmatpush3.bf16.msra.mxu0 %v2627_v23 }
 0x430   : > { %v1336_v35 = vpop.f32.mrb[45].mxu0  ;;  %2481 = vmatprep.subr.bf16.mxu0 %v2628_v31 }
 0x431   : > { %v2438_v39 = vpop.f32.mrb[46].mxu0 }
 0x432   : > { %v1392_v41 = vpack.c.bf16 %v2438_v39, %v2437_v33  ;;  %v1339_v47 = vpop.f32.mrb[47].mxu0 }
 0x433   : > { %v1391_v48 = vpack.c.bf16 %v1339_v47, %v1336_v35  ;;  %2482 = vmatpush3.bf16.msra.mxu0 %v2628_v31 }
 0x434   : > { %2483 = vmatprep.subr.bf16.mxu0 %v2629_v36 }
 0x435   : > { %2467 = vmatprep.mubr.bf16.mxu0 %v1391_v48 }
 0x436   : > { %2468 = vmatmul.mubr.bf16.gmra.mrb[60].mxu0 %v1392_v41 }
 0x437   : > { %2484 = vmatpush3.bf16.msra.mxu0 %v2629_v36  ;;  %2487 = vmatprep.mubr.bf16.mxu0 %v3078_v62  ;;  %v2634_v62 = vld [vmem:[%s3296_s7 + $0x18] sm:$0xff]  }
 0x438   : > { %2485 = vmatprep.subr.bf16.mxu0 %v2630_v54  ;;  %2509 = vmatprep.subr.bf16.mxu1 %v2634_v62 }
 0x439   : > { %2510 = vmatpush3.bf16.msra.mxu1 %v2634_v62 }
 0x43b   : > { %2486 = vmatpush3.bf16.msra.mxu0 %v2630_v54 }
 0x43e   : > { %2488 = vmatmul.mubr.bf16.vlgmr.msra.gmra.mrb[48].mxu0 %v3074_v52  ;;  %v2635_v52 = vld [vmem:[%s3296_s7 + $0x20] sm:$0xff]  }
 0x43f   : > { %2491 = vmatprep.mubr.bf16.mxu0 %v3094_v18  ;;  %2511 = vmatprep.subr.bf16.mxu1 %v2635_v52  ;;  %v2637_v18 = vld [vmem:[%s3296_s7 + $0x30] sm:$0xff]  }
 0x440   : > { %2512 = vmatpush3.bf16.msra.mxu1 %v2635_v52 }
 0x446   : > { %2492 = vmatmul.mubr.bf16.gmra.mrb[52].mxu0 %v3090_v12  ;;  %v2636_v12 = vld [vmem:[%s3296_s7 + $0x28] sm:$0xff]  }
 0x447   : > { %2495 = vmatprep.mubr.bf16.mxu0 %v3106_v34  ;;  %2513 = vmatprep.subr.bf16.mxu1 %v2636_v12  ;;  %v3210_v34 = vld [vmem:[%s3295_s6 + $0x1] ss:$0 sm:$0xff] }
 0x448   : > { %2514 = vmatpush3.bf16.msra.mxu1 %v2636_v12 }
 0x449   : > { %2515 = vmatprep.subr.bf16.mxu1 %v2637_v18 }
 0x44c   : > { %2516 = vmatpush3.bf16.msra.mxu1 %v2637_v18 }
 0x44e   : > { %2496 = vmatmul.mubr.bf16.gmra.mrb[56].mxu0 %v3104_v19  ;;  %v2638_v19 = vld [vmem:[%s3296_s7 + $0x38] sm:$0xff]  }
 0x44f   : > { %2499 = vmatprep.mubr.bf16.mxu0 %v3114_v46  ;;  %2517 = vmatprep.subr.bf16.mxu1 %v2638_v19 }
 0x450   : > { %2518 = vmatpush3.bf16.msra.mxu1 %v2638_v19 }
 0x456   : > { %2500 = vmatmul.mubr.bf16.gmra.mrb[60].mxu0 %v3112_v44 }
 0x511   : > { %v2489_v44 = vpop.f32.mrb[48].mxu0 }
 0x512   : > { %v1693_v46 = vadd.f32 %v2489_v44, %v3210_v34  ;;  %v1620_v57 = vpop.f32.mrb[49].mxu0 }
 0x513   : > { %v1691_v2 = vadd.f32 %v3210_v34, %v1620_v57  ;;  %v2490_v53 = vpop.f32.mrb[50].mxu0 }
 0x514   : > { %v1709_v59 = vadd.f32 %v1693_v46, %v2885_v29  ;;  %v1694_v60 = vadd.f32 %v2490_v53, %v3210_v34  ;;  %v1623_v63 = vpop.f32.mrb[51].mxu0 }
 0x515   : > { %v1707_v0 = vadd.f32 %v1691_v2, %v2873_v16  ;;  %v1692_v4 = vadd.f32 %v3210_v34, %v1623_v63 }
 0x516   : > { %2671 = vtanh.f32 %v1709_v59  ;;  %v1710_v61 = vadd.f32 %v1694_v60, %v2887_v30 }
 0x517   : > { %2673 = vtanh.f32 %v1707_v0  ;;  %v1708_v1 = vadd.f32 %v1692_v4, %v2875_v17  ;;  %v2122_v0 = vld [vmem:[%s3297_s8] ss:$0 sm:$0xff] }
 0x518   : > { %2675 = vtanh.f32 %v1710_v61 }
 0x519   : > { %2677 = vtanh.f32 %v1708_v1  ;;  %v2493_v3 = vpop.f32.mrb[52].mxu0 }
 0x51a   : > { %v1697_v7 = vadd.f32 %v2493_v3, %v3210_v34  ;;  %v1636_v29 = vpop.f32.mrb[53].mxu0 }
 0x51b   : > { %v1695_v32 = vadd.f32 %v3210_v34, %v1636_v29  ;;  %v2494_v9 = vpop.f32.mrb[54].mxu0 }
 0x51c   : > { %v1713_v16 = vadd.f32 %v1697_v7, %v2909_v55  ;;  %v1698_v45 = vadd.f32 %v2494_v9, %v3210_v34  ;;  %v1639_v58 = vpop.f32.mrb[55].mxu0 }
 0x51d   : > { %v1711_v8 = vadd.f32 %v1695_v32, %v2897_v42  ;;  %v1696_v30 = vadd.f32 %v3210_v34, %v1639_v58 }
 0x51e   : > { %2679 = vtanh.f32 %v1713_v16  ;;  %v1714_v17 = vadd.f32 %v1698_v45, %v2911_v56 }
 0x51f   : > { %2681 = vtanh.f32 %v1711_v8  ;;  %v1712_v55 = vadd.f32 %v1696_v30, %v2899_v43 }
 0x520   : > { %v2672_v24 = vpop.eup %2671  ;;  %2683 = vtanh.f32 %v1714_v17 }
 0x521   : > { %v2674_v42 = vpop.eup %2673  ;;  %1741 = vst [vmem:[%s3231_s12 + $0x20] sm:$0xff] %v2672_v24  ;;  %2685 = vtanh.f32 %v1712_v55  ;;  %v2497_v10 = vpop.f32.mrb[56].mxu0 }
 0x522   : > { %v2676_v40 = vpop.eup %2675  ;;  %1739 = vst [vmem:[%s3231_s12] sm:$0xff] %v2674_v42  ;;  %v1701_v51 = vadd.f32 %v2497_v10, %v3210_v34  ;;  %v1652_v11 = vpop.f32.mrb[57].mxu0 }
 0x523   : > { %v2678_v13 = vpop.eup %2677  ;;  %1742 = vst [vmem:[%s3231_s12 + $0x30] sm:$0xff] %v2676_v40  ;;  %v1699_v14 = vadd.f32 %v3210_v34, %v1652_v11  ;;  %v2498_v56 = vpop.f32.mrb[58].mxu0  ;;  %v1772_v15 = vpack.c.bf16 %v2676_v40, %v2672_v24 }
 0x524   : > { %1740 = vst [vmem:[%s3231_s12 + $0x10] sm:$0xff] %v2678_v13  ;;  %v1717_v43 = vadd.f32 %v1701_v51, %v2933_v21  ;;  %v1702_v20 = vadd.f32 %v2498_v56, %v3210_v34  ;;  %v1655_v23 = vpop.f32.mrb[59].mxu0  ;;  %v1771_v25 = vpack.c.bf16 %v2678_v13, %v2674_v42 }
 0x525   : > { %v1715_v26 = vadd.f32 %v1699_v14, %v2921_v5  ;;  %v1700_v27 = vadd.f32 %v3210_v34, %v1655_v23 }
 0x526   : > { %2687 = vtanh.f32 %v1717_v43  ;;  %v1718_v28 = vadd.f32 %v1702_v20, %v2935_v22  ;;  %2519 = vmatprep.mubr.bf16.mxu1 %v1771_v25 }
 0x527   : > { %2689 = vtanh.f32 %v1715_v26  ;;  %v1716_v31 = vadd.f32 %v1700_v27, %v2923_v6  ;;  %2520 = vmatmul.mubr.bf16.vlgmr.msra.gmra.mrb[32].mxu1 %v1772_v15 }
 0x528   : > { %v2680_v21 = vpop.eup %2679  ;;  %2691 = vtanh.f32 %v1718_v28 }
 0x529   : > { %v2682_v33 = vpop.eup %2681  ;;  %1745 = vst [vmem:[%s3231_s12 + $0x60] sm:$0xff] %v2680_v21  ;;  %2693 = vtanh.f32 %v1716_v31  ;;  %v2501_v35 = vpop.f32.mrb[60].mxu0 }
 0x52a   : > { %v2684_v36 = vpop.eup %2683  ;;  %1743 = vst [vmem:[%s3231_s12 + $0x40] sm:$0xff] %v2682_v33  ;;  %v1705_v5 = vadd.f32 %v2501_v35, %v3210_v34  ;;  %v1668_v39 = vpop.f32.mrb[61].mxu0 }
 0x52b   : > { %v2686_v41 = vpop.eup %2685  ;;  %1746 = vst [vmem:[%s3231_s12 + $0x70] sm:$0xff] %v2684_v36  ;;  %v1703_v22 = vadd.f32 %v3210_v34, %v1668_v39  ;;  %v2502_v47 = vpop.f32.mrb[62].mxu0  ;;  %v1774_v48 = vpack.c.bf16 %v2684_v36, %v2680_v21 }
 0x52c   : > { %1744 = vst [vmem:[%s3231_s12 + $0x50] sm:$0xff] %v2686_v41  ;;  %v1721_v6 = vadd.f32 %v1705_v5, %v2957_v49  ;;  %v1706_v54 = vadd.f32 %v2502_v47, %v3210_v34  ;;  %v1671_v62 = vpop.f32.mrb[63].mxu0  ;;  %v1773_v52 = vpack.c.bf16 %v2686_v41, %v2682_v33 }
 0x52d   : > { %v1719_v12 = vadd.f32 %v1703_v22, %v2945_v37  ;;  %v1704_v18 = vadd.f32 %v3210_v34, %v1671_v62 }
 0x52e   : > { %2695 = vtanh.f32 %v1721_v6  ;;  %v1722_v19 = vadd.f32 %v1706_v54, %v2959_v50  ;;  %2523 = vmatprep.mubr.bf16.mxu1 %v1773_v52 }
 0x52f   : > { %2697 = vtanh.f32 %v1719_v12  ;;  %v1720_v44 = vadd.f32 %v1704_v18, %v2947_v38  ;;  %2524 = vmatmul.mubr.bf16.gmra.mrb[36].mxu1 %v1774_v48 }
 0x530   : > { %v2688_v49 = vpop.eup %2687  ;;  %2699 = vtanh.f32 %v1722_v19 }
 0x531   : > { %v2690_v46 = vpop.eup %2689  ;;  %1749 = vst [vmem:[%s3231_s12 + $0xa0] sm:$0xff] %v2688_v49  ;;  %2701 = vtanh.f32 %v1720_v44 }
 0x532   : > { %v2692_v37 = vpop.eup %2691  ;;  %1747 = vst [vmem:[%s3231_s12 + $0x80] sm:$0xff] %v2690_v46 }
 0x533   : > { %v2694_v34 = vpop.eup %2693  ;;  %1750 = vst [vmem:[%s3231_s12 + $0xb0] sm:$0xff] %v2692_v37  ;;  %v1776_v57 = vpack.c.bf16 %v2692_v37, %v2688_v49 }
 0x534   : > { %1748 = vst [vmem:[%s3231_s12 + $0x90] sm:$0xff] %v2694_v34  ;;  %v1775_v50 = vpack.c.bf16 %v2694_v34, %v2690_v46 }
 0x536   : > { %2527 = vmatprep.mubr.bf16.mxu1 %v1775_v50 }
 0x537   : > { %2528 = vmatmul.mubr.bf16.gmra.mrb[40].mxu1 %v1776_v57 }
 0x538   : > { %v2696_v38 = vpop.eup %2695 }
 0x539   : > { %v2698_v2 = vpop.eup %2697  ;;  %1753 = vst [vmem:[%s3231_s12 + $0xe0] sm:$0xff] %v2696_v38 }
 0x53a   : > { %v2700_v53 = vpop.eup %2699  ;;  %1751 = vst [vmem:[%s3231_s12 + $0xc0] sm:$0xff] %v2698_v2 }
 0x53b   : > { %v2702_v59 = vpop.eup %2701  ;;  %1754 = vst [vmem:[%s3231_s12 + $0xf0] sm:$0xff] %v2700_v53  ;;  %v1778_v60 = vpack.c.bf16 %v2700_v53, %v2696_v38 }
 0x53c   : > { %1752 = vst [vmem:[%s3231_s12 + $0xd0] sm:$0xff] %v2702_v59  ;;  %v1777_v63 = vpack.c.bf16 %v2702_v59, %v2698_v2 }
 0x53e   : > { %2531 = vmatprep.mubr.bf16.mxu1 %v1777_v63 }
 0x53f   : > { %2532 = vmatmul.mubr.bf16.gmra.mrb[44].mxu1 %v1778_v60 }
 0x5fa   : > { %v2521_v4 = vpop.f32.mrb[32].mxu1 }
 0x5fb   : > { %v1877_v61 = vadd.f32 %v2521_v4, %v2122_v0  ;;  %v1868_v1 = vpop.f32.mrb[33].mxu1 }
 0x5fc   : > { %v1869_v3 = vadd.f32 %v2122_v0, %v1868_v1  ;;  %v2522_v7 = vpop.f32.mrb[34].mxu1 }
 0x5fd   : > { %1933 = vst [vmem:[%s3231_s12 + $0x28] sm:$0xff] %v1877_v61  ;;  %v1880_v29 = vadd.f32 %v2522_v7, %v2122_v0  ;;  %v1871_v32 = vpop.f32.mrb[35].mxu1 }
 0x5fe   : > { %1931 = vst [vmem:[%s3231_s12 + $0x8] sm:$0xff] %v1869_v3  ;;  %v1872_v9 = vadd.f32 %v2122_v0, %v1871_v32 }
 0x5ff   : > { %1934 = vst [vmem:[%s3231_s12 + $0x38] sm:$0xff] %v1880_v29 }
 0x600   : > { %1932 = vst [vmem:[%s3231_s12 + $0x18] sm:$0xff] %v1872_v9 }
 0x602   : > { %v2525_v16 = vpop.f32.mrb[36].mxu1 }
 0x603   : > { %v1893_v45 = vadd.f32 %v2525_v16, %v2122_v0  ;;  %v1884_v58 = vpop.f32.mrb[37].mxu1 }
 0x604   : > { %v1885_v8 = vadd.f32 %v2122_v0, %v1884_v58  ;;  %v2526_v30 = vpop.f32.mrb[38].mxu1 }
 0x605   : > { %1937 = vst [vmem:[%s3231_s12 + $0x68] sm:$0xff] %v1893_v45  ;;  %v1896_v17 = vadd.f32 %v2526_v30, %v2122_v0  ;;  %v1887_v55 = vpop.f32.mrb[39].mxu1 }
 0x606   : > { %1935 = vst [vmem:[%s3231_s12 + $0x48] sm:$0xff] %v1885_v8  ;;  %v1888_v24 = vadd.f32 %v2122_v0, %v1887_v55 }
 0x607   : > { %1938 = vst [vmem:[%s3231_s12 + $0x78] sm:$0xff] %v1896_v17 }
 0x608   : > { %1936 = vst [vmem:[%s3231_s12 + $0x58] sm:$0xff] %v1888_v24 }
 0x60a   : > { %v2529_v42 = vpop.f32.mrb[40].mxu1 }
 0x60b   : > { %v1909_v10 = vadd.f32 %v2529_v42, %v2122_v0  ;;  %v1900_v40 = vpop.f32.mrb[41].mxu1 }
 0x60c   : > { %v1901_v51 = vadd.f32 %v2122_v0, %v1900_v40  ;;  %v2530_v11 = vpop.f32.mrb[42].mxu1 }
 0x60d   : > { %1941 = vst [vmem:[%s3231_s12 + $0xa8] sm:$0xff] %v1909_v10  ;;  %v1912_v13 = vadd.f32 %v2530_v11, %v2122_v0  ;;  %v1903_v14 = vpop.f32.mrb[43].mxu1 }
 0x60e   : > { %1939 = vst [vmem:[%s3231_s12 + $0x88] sm:$0xff] %v1901_v51  ;;  %v1904_v56 = vadd.f32 %v2122_v0, %v1903_v14 }
 0x60f   : > { %1942 = vst [vmem:[%s3231_s12 + $0xb8] sm:$0xff] %v1912_v13 }
 0x610   : > { %1940 = vst [vmem:[%s3231_s12 + $0x98] sm:$0xff] %v1904_v56 }
 0x612   : > { %v2533_v15 = vpop.f32.mrb[44].mxu1 }
 0x613   : > { %v1925_v43 = vadd.f32 %v2533_v15, %v2122_v0  ;;  %v1916_v20 = vpop.f32.mrb[45].mxu1 }
 0x614   : > { %v1917_v23 = vadd.f32 %v2122_v0, %v1916_v20  ;;  %v2534_v25 = vpop.f32.mrb[46].mxu1 }
 0x615   : > { %1945 = vst [vmem:[%s3231_s12 + $0xe8] sm:$0xff] %v1925_v43  ;;  %v1928_v26 = vadd.f32 %v2534_v25, %v2122_v0  ;;  %v1919_v27 = vpop.f32.mrb[47].mxu1 }
 0x616   : > { %1943 = vst [vmem:[%s3231_s12 + $0xc8] sm:$0xff] %v1917_v23  ;;  %v1920_v28 = vadd.f32 %v2122_v0, %v1919_v27 }
 0x617   : > { %1946 = vst [vmem:[%s3231_s12 + $0xf8] sm:$0xff] %v1928_v26 }
 0x618   : > { %1944 = vst [vmem:[%s3231_s12 + $0xd8] sm:$0xff] %v1920_v28 }
 0x619 PF: > { %s19_s30 = sadd.s32 1, %s2709_s30  }
 0x61a   : > { %p16_p4 = scmp.ge.s32.totalorder %s19_s30, 4  }
 0x61c   :  { %18 = sbr.rel (!%p16_p4) target bundleno = 1 (0x1), region = 92 }

</bundles_post_ra>
